<compile_context>
chip_gen: v6e
topology: v6e:2x2x1
jax: 0.10.0
libtpu: 0.0.40
codegen_flags: <defaults>
</compile_context>

<pallas_src>
import jax
import jax.numpy as jnp
import numpy as np
from jax.experimental import pallas as pl
from jax.experimental.pallas import tpu as pltpu

EPS = 1e-5


# ------------------------------ kernels ---------------------------------------

def _layernorm_bf16(x_f32, gamma, beta):
    """fp32 LayerNorm (biased variance, matches nn.LayerNorm), bf16 result."""
    mean = jnp.mean(x_f32, axis=-1, keepdims=True)
    var = jnp.mean(jnp.square(x_f32 - mean), axis=-1, keepdims=True)
    xn = (x_f32 - mean) * jax.lax.rsqrt(var + EPS) * gamma + beta
    return xn.astype(jnp.bfloat16)


def _ffn_resident_kernel(x_ref, g_ref, b_ref, w1_ref, b1_ref, w2_ref, b2_ref,
                         o_ref):
    """One (block_m x D) output tile; W1/W2 fully VMEM-resident (grid = (M/bm,))."""
    xn = _layernorm_bf16(x_ref[...].astype(jnp.float32), g_ref[0], b_ref[0])
    h = jnp.dot(xn, w1_ref[...], preferred_element_type=jnp.float32)
    h = jnp.maximum(h + b1_ref[0], 0.0)
    y = jnp.dot(h.astype(jnp.bfloat16), w2_ref[...],
                preferred_element_type=jnp.float32)
    o_ref[...] = (y + b2_ref[0]).astype(o_ref.dtype)


def _ffn_stream_kernel(x_ref, g_ref, b_ref, w1_ref, b1_ref, w2_ref, b2_ref,
                       o_ref, xn_ref):
    """One (block_m x D) output tile, reduced over inner-dim blocks.

    Grid = (M / block_m, inner / block_inner); axis 0 parallel, axis 1 reduction.
    The fp32 output block o_ref (index map ignores j -> VMEM-resident across the
    reduction) is used directly as the accumulator, initialised with the bias b2.
    xn_ref caches LayerNorm(x) for the tile in bf16.
    """
    j = pl.program_id(1)

    @pl.when(j == 0)
    def _():
        xn_ref[...] = _layernorm_bf16(x_ref[...].astype(jnp.float32),
                                      g_ref[0], b_ref[0])
        o_ref[...] = jnp.broadcast_to(b2_ref[0], o_ref.shape).astype(o_ref.dtype)

    # h_j = relu(xn @ W1[:, j_block] + b1[j_block])   (bf16 operands, fp32 accumulate)
    h = jnp.dot(xn_ref[...], w1_ref[...], preferred_element_type=jnp.float32)
    h = jnp.maximum(h + b1_ref[0], 0.0)
    # out += h_j @ W2[j_block, :]
    o_ref[...] += jnp.dot(h.astype(jnp.bfloat16), w2_ref[...],
                          preferred_element_type=jnp.float32).astype(o_ref.dtype)


# ------------------------------ wrapper ----------------------------------------

def feed_forward(x, params, *, block_m=256, block_inner=512,
                 resident_weight_budget=24 << 20, vmem_limit_bytes=None):
    """Eval-mode FeedForward.forward(x): Dropout(W2 @ relu(W1 @ LN(x) + b1) + b2).

    x: (B, T, D) fp32.  Returns (B, T, D) fp32.
    Weights in `params` are expected in bf16 (cast once at init, not per call).
    """
    B, T, D = x.shape
    inner = params["w1"].shape[1]
    M = B * T

    assert D % 128 == 0, "model dim should be a multiple of 128 for lane-dense tiles"

    # ---- M tile: as big as requested, but keep >= 2 tiles so the 'parallel'
    #      axis can still shard across v7x's two TensorCores.
    bm = min(block_m, M)
    assert M % bm == 0 and bm % 8 == 0, "B*T must tile into 8-aligned row blocks"
    if M // bm < 2 and M >= 16 and (M // 2) % 8 == 0:
        bm = M // 2

    x2d = x.reshape(M, D)
    w1 = params["w1"].astype(jnp.bfloat16)   # no-op when already bf16
    w2 = params["w2"].astype(jnp.bfloat16)
    b1 = params["b1"].astype(jnp.float32)
    b2 = params["b2"].astype(jnp.float32)
    gamma = params["ln_g"].astype(jnp.float32)
    beta = params["ln_b"].astype(jnp.float32)

    weight_bytes = 2 * D * inner * 2          # bf16 W1 + W2
    use_resident = weight_bytes <= resident_weight_budget

    if use_resident:
        # ----------------- resident-weights path: grid = (M // bm,) ------------
        if vmem_limit_bytes is None:
            est = (2 * bm * D * 4       # x double buffer (fp32)
                   + 2 * bm * D * 4     # out double buffer (fp32)
                   + 2 * weight_bytes   # W1 + W2 (worst case double-buffered)
                   + bm * inner * 4     # h intermediate
                   + (1 << 20))
            vmem_limit_bytes = int(min(max(est, 32 << 20), 100 << 20))

        out2d = pl.pallas_call(
            _ffn_resident_kernel,
            out_shape=jax.ShapeDtypeStruct((M, D), x.dtype),
            grid=(M // bm,),
            in_specs=[
                pl.BlockSpec((bm, D), lambda i: (i, 0)),        # x rows
                pl.BlockSpec((1, D), lambda i: (0, 0)),         # ln gamma
                pl.BlockSpec((1, D), lambda i: (0, 0)),         # ln beta
                pl.BlockSpec((D, inner), lambda i: (0, 0)),     # W1 (resident)
                pl.BlockSpec((1, inner), lambda i: (0, 0)),     # b1
                pl.BlockSpec((inner, D), lambda i: (0, 0)),     # W2 (resident)
                pl.BlockSpec((1, D), lambda i: (0, 0)),         # b2
            ],
            out_specs=pl.BlockSpec((bm, D), lambda i: (i, 0)),
            compiler_params=pltpu.CompilerParams(
                dimension_semantics=("parallel",),
                vmem_limit_bytes=vmem_limit_bytes),
        )(x2d, gamma, beta, w1, b1, w2, b2)
    else:
        # ----------------- streaming path: grid = (M // bm, inner // bn) -------
        bn = min(block_inner, inner)
        assert inner % bn == 0 and bn % 128 == 0, \
            "inner must tile into 128-aligned blocks"

        if vmem_limit_bytes is None:
            est = (2 * bm * D * 4                 # x double buffer (fp32)
                   + 2 * bm * D * 4               # out double buffer (fp32)
                   + 2 * 2 * D * bn * 2           # W1 + W2 block double buffers
                   + bm * D * 2                   # xn scratch (bf16)
                   + bm * bn * 4                  # h intermediate
                   + (1 << 20))
            vmem_limit_bytes = int(min(max(est, 32 << 20), 100 << 20))

        out2d = pl.pallas_call(
            _ffn_stream_kernel,
            out_shape=jax.ShapeDtypeStruct((M, D), x.dtype),
            grid=(M // bm, inner // bn),
            in_specs=[
                pl.BlockSpec((bm, D), lambda i, j: (i, 0)),     # x rows
                pl.BlockSpec((1, D), lambda i, j: (0, 0)),      # ln gamma
                pl.BlockSpec((1, D), lambda i, j: (0, 0)),      # ln beta
                pl.BlockSpec((D, bn), lambda i, j: (0, j)),     # W1 column block
                pl.BlockSpec((1, bn), lambda i, j: (0, j)),     # b1 block
                pl.BlockSpec((bn, D), lambda i, j: (j, 0)),     # W2 row block
                pl.BlockSpec((1, D), lambda i, j: (0, 0)),      # b2
            ],
            out_specs=pl.BlockSpec((bm, D), lambda i, j: (i, 0)),
            scratch_shapes=[
                pltpu.VMEM((bm, D), jnp.bfloat16),   # cached LayerNorm(x) tile
            ],
            compiler_params=pltpu.CompilerParams(
                dimension_semantics=("parallel", "arbitrary"),
                vmem_limit_bytes=vmem_limit_bytes),
        )(x2d, gamma, beta, w1, b1, w2, b2)

    return out2d.reshape(B, T, D)


# ------------------------------ reference (JAX) --------------------------------

def feed_forward_ref(x, params):
    """Pure-JAX reference with the same bf16-operand / fp32-accumulate math."""
    x = x.astype(jnp.float32)
    mean = jnp.mean(x, axis=-1, keepdims=True)
    var = jnp.mean(jnp.square(x - mean), axis=-1, keepdims=True)
    g = params["ln_g"].astype(jnp.float32)[0]
    b = params["ln_b"].astype(jnp.float32)[0]
    xn = (x - mean) * jax.lax.rsqrt(var + EPS) * g + b
    h = jnp.dot(xn.astype(jnp.bfloat16), params["w1"].astype(jnp.bfloat16),
                preferred_element_type=jnp.float32) + params["b1"].astype(jnp.float32)[0]
    h = jnp.maximum(h, 0.0)
    y = jnp.dot(h.astype(jnp.bfloat16), params["w2"].astype(jnp.bfloat16),
                preferred_element_type=jnp.float32) + params["b2"].astype(jnp.float32)[0]
    return y


# ------------------------------ parameter init ---------------------------------

def init_params(key, D, inner):
    """Weights stored in bf16 (matmul operand dtype) so no per-call cast traffic."""
    k1, k2, k3, k4 = jax.random.split(key, 4)
    w = lambda k, shape: (0.02 * jax.random.normal(k, shape)).astype(jnp.float32)
    return {
        "ln_g": jnp.ones((1, D), jnp.float32),
        "ln_b": jnp.zeros((1, D), jnp.float32),
        "w1": w(k1, (D, inner)).astype(jnp.bfloat16),
        "b1": w(k2, (1, inner)),
        "w2": w(k3, (inner, D)).astype(jnp.bfloat16),
        "b2": w(k4, (1, D)),
    }


# ----------------------------------- main ---------------------------------------

if __name__ == "__main__":
    B, T = 2, 128                 # batch, sequence length  (M = B*T = 256 rows)
    D, INNER = 128, 512           # model_size, inner_size  (lane-aligned)

    key = jax.random.PRNGKey(0)
    k_x, k_p = jax.random.split(key, 2)
    x = jax.random.normal(k_x, (B, T, D), jnp.float32)
    params = init_params(k_p, D, INNER)

    ref = jax.block_until_ready(feed_forward_ref(x, params))

    # Default path: weights are tiny -> fully VMEM-resident, 1-D grid over M.
    out = jax.block_until_ready(feed_forward(x, params))
    assert out.shape == (B, T, D)
    assert bool(jnp.all(jnp.isfinite(out)))
    np.testing.assert_allclose(np.asarray(out), np.asarray(ref), atol=1e-3, rtol=1e-3)

    # Streaming path (forced): inner-dim reduction with o_ref as the accumulator.
    out_s = jax.block_until_ready(
        feed_forward(x, params, block_inner=256, resident_weight_budget=0))
    np.testing.assert_allclose(np.asarray(out_s), np.asarray(ref), atol=1e-3, rtol=1e-3)

    print("KERNEL_OK")
</pallas_src>

<mosaic_0001>
module attributes {stable_mosaic.version = 11 : i64} {
  func.func @_ffn_resident_kernel(%arg0: i32, %arg1: memref<128x128xf32, #tpu.memory_space<vmem>>, %arg2: memref<1x128xf32, #tpu.memory_space<vmem>>, %arg3: memref<1x128xf32, #tpu.memory_space<vmem>>, %arg4: memref<128x512xbf16, #tpu.memory_space<vmem>>, %arg5: memref<1x512xf32, #tpu.memory_space<vmem>>, %arg6: memref<512x128xbf16, #tpu.memory_space<vmem>>, %arg7: memref<1x128xf32, #tpu.memory_space<vmem>>, %arg8: memref<128x128xf32, #tpu.memory_space<vmem>>) attributes {dimension_semantics = [#tpu.dimension_semantics<parallel>], iteration_bounds = array<i64: 2>, scalar_prefetch = 0 : i64, scratch_operands = 0 : i64, tpu.core_type = #tpu.core_type<tc>, window_params = [{transform_indices = @transform_0, window_bounds = array<i64: 128, 128>}, {pipeline_mode = #tpu.pipeline_mode<synchronous>, transform_indices = @transform_1, window_bounds = array<i64: 1, 128>}, {pipeline_mode = #tpu.pipeline_mode<synchronous>, transform_indices = @transform_2, window_bounds = array<i64: 1, 128>}, {pipeline_mode = #tpu.pipeline_mode<synchronous>, transform_indices = @transform_3, window_bounds = array<i64: 128, 512>}, {pipeline_mode = #tpu.pipeline_mode<synchronous>, transform_indices = @transform_4, window_bounds = array<i64: 1, 512>}, {pipeline_mode = #tpu.pipeline_mode<synchronous>, transform_indices = @transform_5, window_bounds = array<i64: 512, 128>}, {pipeline_mode = #tpu.pipeline_mode<synchronous>, transform_indices = @transform_6, window_bounds = array<i64: 1, 128>}, {transform_indices = @transform_7, window_bounds = array<i64: 128, 128>}]} {
    %c0 = arith.constant 0 : index
    %c0_0 = arith.constant 0 : index
    %0 = vector.load %arg1[%c0, %c0_0] : memref<128x128xf32, #tpu.memory_space<vmem>>, vector<128x128xf32>
    %c0_1 = arith.constant 0 : index
    %c0_2 = arith.constant 0 : index
    %1 = vector.load %arg2[%c0_1, %c0_2] : memref<1x128xf32, #tpu.memory_space<vmem>>, vector<1x128xf32>
    %2 = vector.shape_cast %1 : vector<1x128xf32> to vector<128xf32>
    %c0_3 = arith.constant 0 : index
    %c0_4 = arith.constant 0 : index
    %3 = vector.load %arg3[%c0_3, %c0_4] : memref<1x128xf32, #tpu.memory_space<vmem>>, vector<1x128xf32>
    %4 = vector.shape_cast %3 : vector<1x128xf32> to vector<128xf32>
    %cst = arith.constant dense<0.000000e+00> : vector<128xf32>
    %5 = vector.multi_reduction <add>, %0, %cst [1] : vector<128x128xf32> to vector<128xf32>
    %6 = vector.shape_cast %5 : vector<128xf32> to vector<128x1xf32>
    %cst_5 = arith.constant 1.280000e+02 : f32
    %7 = vector.broadcast %cst_5 : f32 to vector<128x1xf32>
    %8 = arith.divf %6, %7 : vector<128x1xf32>
    %9 = vector.broadcast %8 : vector<128x1xf32> to vector<128x128xf32>
    %10 = arith.subf %0, %9 : vector<128x128xf32>
    %11 = arith.mulf %10, %10 : vector<128x128xf32>
    %cst_6 = arith.constant dense<0.000000e+00> : vector<128xf32>
    %12 = vector.multi_reduction <add>, %11, %cst_6 [1] : vector<128x128xf32> to vector<128xf32>
    %13 = vector.shape_cast %12 : vector<128xf32> to vector<128x1xf32>
    %cst_7 = arith.constant 1.280000e+02 : f32
    %14 = vector.broadcast %cst_7 : f32 to vector<128x1xf32>
    %15 = arith.divf %13, %14 : vector<128x1xf32>
    %16 = vector.broadcast %8 : vector<128x1xf32> to vector<128x128xf32>
    %17 = arith.subf %0, %16 : vector<128x128xf32>
    %cst_8 = arith.constant 9.99999974E-6 : f32
    %18 = vector.broadcast %cst_8 : f32 to vector<128x1xf32>
    %19 = arith.addf %15, %18 : vector<128x1xf32>
    %20 = math.rsqrt %19 : vector<128x1xf32>
    %21 = vector.broadcast %20 : vector<128x1xf32> to vector<128x128xf32>
    %22 = arith.mulf %17, %21 : vector<128x128xf32>
    %23 = vector.shape_cast %2 : vector<128xf32> to vector<1x128xf32>
    %24 = vector.broadcast %23 : vector<1x128xf32> to vector<128x128xf32>
    %25 = arith.mulf %22, %24 : vector<128x128xf32>
    %26 = vector.shape_cast %4 : vector<128xf32> to vector<1x128xf32>
    %27 = vector.broadcast %26 : vector<1x128xf32> to vector<128x128xf32>
    %28 = arith.addf %25, %27 : vector<128x128xf32>
    %29 = arith.truncf %28 : vector<128x128xf32> to vector<128x128xbf16>
    %c0_9 = arith.constant 0 : index
    %c0_10 = arith.constant 0 : index
    %30 = vector.load %arg4[%c0_9, %c0_10] : memref<128x512xbf16, #tpu.memory_space<vmem>>, vector<128x512xbf16>
    %cst_11 = arith.constant dense<0.000000e+00> : vector<128x512xf32>
    %31 = tpu.matmul %29, %30, %cst_11 {dimension_numbers = #tpu.dot_dimension_numbers<[1], [0], [0], [1], [0, 0, 1, 1], [], []>} : vector<128x128xbf16>, vector<128x512xbf16>, vector<128x512xf32> -> vector<128x512xf32>
    %c0_12 = arith.constant 0 : index
    %c0_13 = arith.constant 0 : index
    %32 = vector.load %arg5[%c0_12, %c0_13] : memref<1x512xf32, #tpu.memory_space<vmem>>, vector<1x512xf32>
    %33 = vector.shape_cast %32 : vector<1x512xf32> to vector<512xf32>
    %34 = vector.shape_cast %33 : vector<512xf32> to vector<1x512xf32>
    %35 = vector.broadcast %34 : vector<1x512xf32> to vector<128x512xf32>
    %36 = arith.addf %31, %35 : vector<128x512xf32>
    %cst_14 = arith.constant 0.000000e+00 : f32
    %37 = vector.broadcast %cst_14 : f32 to vector<128x512xf32>
    %38 = arith.maximumf %36, %37 : vector<128x512xf32>
    %39 = arith.truncf %38 : vector<128x512xf32> to vector<128x512xbf16>
    %c0_15 = arith.constant 0 : index
    %c0_16 = arith.constant 0 : index
    %40 = vector.load %arg6[%c0_15, %c0_16] : memref<512x128xbf16, #tpu.memory_space<vmem>>, vector<512x128xbf16>
    %cst_17 = arith.constant dense<0.000000e+00> : vector<128x128xf32>
    %41 = tpu.matmul %39, %40, %cst_17 {dimension_numbers = #tpu.dot_dimension_numbers<[1], [0], [0], [1], [0, 0, 1, 1], [], []>} : vector<128x512xbf16>, vector<512x128xbf16>, vector<128x128xf32> -> vector<128x128xf32>
    %c0_18 = arith.constant 0 : index
    %c0_19 = arith.constant 0 : index
    %42 = vector.load %arg7[%c0_18, %c0_19] : memref<1x128xf32, #tpu.memory_space<vmem>>, vector<1x128xf32>
    %43 = vector.shape_cast %42 : vector<1x128xf32> to vector<128xf32>
    %44 = vector.shape_cast %43 : vector<128xf32> to vector<1x128xf32>
    %45 = vector.broadcast %44 : vector<1x128xf32> to vector<128x128xf32>
    %46 = arith.addf %41, %45 : vector<128x128xf32>
    %c0_20 = arith.constant 0 : index
    %c0_21 = arith.constant 0 : index
    %47 = vector.load %arg8[%c0_20, %c0_21] : memref<128x128xf32, #tpu.memory_space<vmem>>, vector<128x128xf32>
    tpu.vector_store %arg8[%c0_20, %c0_21], %46 {strides = array<i32>} : memref<128x128xf32, #tpu.memory_space<vmem>>, vector<128x128xf32>,
    return
  }
  func.func @transform_0(%arg0: i32) -> (i32, i32) {
    %c0_i32 = arith.constant 0 : i32
    %c0_i32_0 = arith.constant 0 : i32
    return %arg0, %c0_i32 : i32, i32
  }
  func.func @transform_1(%arg0: i32) -> (i32, i32) {
    %c0_i32 = arith.constant 0 : i32
    %c0_i32_0 = arith.constant 0 : i32
    %c0_i32_1 = arith.constant 0 : i32
    return %c0_i32, %c0_i32_0 : i32, i32
  }
  func.func @transform_2(%arg0: i32) -> (i32, i32) {
    %c0_i32 = arith.constant 0 : i32
    %c0_i32_0 = arith.constant 0 : i32
    %c0_i32_1 = arith.constant 0 : i32
    return %c0_i32, %c0_i32_0 : i32, i32
  }
  func.func @transform_3(%arg0: i32) -> (i32, i32) {
    %c0_i32 = arith.constant 0 : i32
    %c0_i32_0 = arith.constant 0 : i32
    %c0_i32_1 = arith.constant 0 : i32
    return %c0_i32, %c0_i32_0 : i32, i32
  }
  func.func @transform_4(%arg0: i32) -> (i32, i32) {
    %c0_i32 = arith.constant 0 : i32
    %c0_i32_0 = arith.constant 0 : i32
    %c0_i32_1 = arith.constant 0 : i32
    return %c0_i32, %c0_i32_0 : i32, i32
  }
  func.func @transform_5(%arg0: i32) -> (i32, i32) {
    %c0_i32 = arith.constant 0 : i32
    %c0_i32_0 = arith.constant 0 : i32
    %c0_i32_1 = arith.constant 0 : i32
    return %c0_i32, %c0_i32_0 : i32, i32
  }
  func.func @transform_6(%arg0: i32) -> (i32, i32) {
    %c0_i32 = arith.constant 0 : i32
    %c0_i32_0 = arith.constant 0 : i32
    %c0_i32_1 = arith.constant 0 : i32
    return %c0_i32, %c0_i32_0 : i32, i32
  }
  func.func @transform_7(%arg0: i32) -> (i32, i32) {
    %c0_i32 = arith.constant 0 : i32
    %c0_i32_0 = arith.constant 0 : i32
    return %arg0, %c0_i32 : i32, i32
  }
}

</mosaic_0001>

<bundles_post_ra>
// kernel: tpu_custom_call.1
= control target key start
LH: loop header
LB: loop body
LE: loop exit
PB: predicated region body
PF: predicated region fallthrough
CT: control target
= control target key end

     0   :  { %s2792_s0 = inlined_call_operand.hbm [shape: f32[256,128], index: 0, kind: input, shape index: {}]   ;;  %s2793_s1 = inlined_call_operand.vmem [shape: f32[1,128], index: 1, kind: input, shape index: {}]   ;;  %s2794_s2 = inlined_call_operand.vmem [shape: f32[1,128], index: 2, kind: input, shape index: {}]   ;;  %s2795_s3 = inlined_call_operand.hbm [shape: bf16[128,512], index: 3, kind: input, shape index: {}]   ;;  %s2796_s4 = inlined_call_operand.vmem [shape: f32[1,512], index: 4, kind: input, shape index: {}]   ;;  %s2797_s5 = inlined_call_operand.hbm [shape: bf16[512,128], index: 5, kind: input, shape index: {}]   ;;  %s2798_s6 = inlined_call_operand.vmem [shape: f32[1,128], index: 6, kind: input, shape index: {}]   ;;  %s2799_s7 = inlined_call_operand.hbm [shape: f32[256,128], index: 7, kind: output, shape index: {}]  }
   0x1   :  { %2804 = sst [smem:[#allocation12_spill]] %s2795_s3 }
   0x2   :  { %12 = vsyncpa [#allocation3], 0 }
   0x3   :  { %14 = vsyncpa [#allocation3 + $0x1], 0 }
   0x4   :  { %15 = vsyncpa [#allocation6], 0 }
   0x5   :  { %16 = vsyncpa [#allocation4], 0 }
   0x6   :  { %18 = vsyncpa [#allocation4 + $0x1], 0  ;;  %s2297_s24 = smov 0   ;;  %s2299_s25 = smov 0  }
   0x7   :  { %s2301_s26 = smov 0   ;;  %s2303_s27 = smov 0  }
   0x8 LB: > { %s2318_s28 = sadd.s32 4294967295, %s2242_s27   ;;  %s1691_s29 = sadd.s32 4294967294, %s2242_s27   ;;  %s2242_s27 = sphi %s2303_s27, %s2823_s27   ;;  %s2238_s26 = sphi %s2301_s26, %s2822_s26   ;;  %s2234_s25 = sphi %s2299_s25, %s2821_s25   ;;  %s2230_s24 = sphi %s2297_s24, %s2820_s24  }
   0x9   : > { %p44_p0 = scmp.ne.s32.totalorder %s2234_s25, %s2230_s24  ;;  %p2800_p1 = scmp.eq.s32.totalorder %s2318_s28, 0 }
   0xa   : > { %p200_p3 = scmp.eq.s32.totalorder %s1691_s29, 1  ;;  %p1692_p5 = scmp.ge.s32.totalorder %s2242_s27, 1 }
   0xb   : > { %p2327_p4 = por %p2800_p1, %p44_p0  ;;  %p207_p7 = scmp.lt.s32.totalorder %s2242_s27, 3 }
   0xc   : > { %p2332_p6 = por %p200_p3, %p44_p0  ;;  %s2244_s10 = smov [#allocation5]  }
   0xd   : > { %s2805_s30 = scalar_select %p2327_p4, 1, 0 }
   0xe   : > { %s2806_s8 = scalar_select %p2332_p6, 1, 0 }
   0xf   : > { %p2337_p8 = pnand %p1692_p5, %p207_p7  ;;  %s225_s11 = sshll.u32 %s2244_s10, 4  ;;  %s226_s11 = int_to_ptr.vmem [resolvable:$true] %s225_s11 }
  0x10   : > { %s2245_s13 = smov [#allocation7]   ;;  %s2105_s15 = scalar_lea.vmem %s226_s11, 4096 }
  0x11   : > { %s2807_s9 = scalar_select %p2337_p8, 1, 0 }
  0x12   : > { %p1918_p9 = pneg %p2337_p8  ;;  %s241_s14 = sshll.u32 %s2245_s13, 4  ;;  %s242_s14 = int_to_ptr.vmem [resolvable:$true] %s241_s14 }
  0x13   : > { %p2106_p13 = scmp.ne.s32.totalorder %s226_s11, %s2105_s15  ;;  %p2113_p5 = scmp.lt.s32.totalorder %s226_s11, %s226_s11 }
  0x14   : > { %p2346_p11 = pnand %p1918_p9, %p2800_p1  ;;  %p2114_p7 = scmp.lt.s32.totalorder %s2105_s15, %s2105_s15 }
  0x16   : > { %p2096_p12 = pneg %p2346_p11  ;;  %p2115_p10 = por %p2114_p7, %p2113_p5 }
  0x18   : > { %p2108_p0 = pnand %p2106_p13, %p2096_p12 }
  0x1a   : > { %p2109_p3 = pneg %p2108_p0 }
  0x1c   : > { %p2116_p9 = pnand %p2115_p10, %p2109_p3 }
  0x1e   : > { %2119 = shalt.err (!%p2116_p9)
}
  0x1f   : > { %s2246_s16 = smov 256   ;;  %s2247_s17 = smov 16  }
  0x20   : > { %s2809_s3 = sld [smem:[#allocation12_spill]]  ;;  %s2131_s20 = scalar_lea.vmem %s242_s14, 4096 }
  0x21   : > { %p2132_p1 = scmp.ne.s32.totalorder %s242_s14, %s2131_s20  ;;  %p2139_p2 = scmp.lt.s32.totalorder %s242_s14, %s242_s14 }
  0x22   : > { %p2140_p6 = scmp.lt.s32.totalorder %s2131_s20, %s2131_s20 }
  0x23   : > { %p2134_p13 = pnand %p2132_p1, %p2096_p12 }
  0x24   : > { %p2141_p5 = por %p2140_p6, %p2139_p2 }
  0x25   : > { %p2135_p0 = pneg %p2134_p13 }
  0x26   : > { %1921 = dma.hbm_to_vmem [thread:$0]  (!%p2346_p11), %s2809_s3, 4096, %s226_s11, [#allocation6], %s2246_s16, %s2246_s16, %s2247_s17  }
  0x27   : > { %p2142_p10 = pnand %p2141_p5, %p2135_p0 }
  0x29   : > { %2145 = shalt.err (!%p2142_p10)
}
  0x2a   : > { %s2248_s21 = smov 64   ;;  %s2249_s22 = smov 4  }
  0x2b   : > { %1924 = dma.hbm_to_vmem [thread:$0]  (!%p2346_p11), %s2797_s5, 4096, %s242_s14, [#allocation6], %s2248_s21, %s2248_s21, %s2249_s22  }
  0x2c   : > { %s2369_s10 = sadd.s32 1, %s2242_s27   ;;  %s31_s13 = sadd.s32 1, %s2238_s26 }
  0x2d   : > { %s28_s11 = ssub.s32 %s2242_s27, %s2369_s10  ;;  %p38_p2 = scmp.ne.s32.totalorder %s2238_s26, %s2234_s25 }
  0x2e   : > { %p29_p1 = scmp.eq.s32.totalorder %s28_s11, 0  ;;  %p39_p6 = scmp.eq.s32.totalorder %s2242_s27, 0 }
  0x2f   : > { %p2810_p3 = scmp.eq.s32.totalorder %s2318_s28, 1  ;;  %p1935_p9 = scmp.lt.s32.totalorder %s2242_s27, 2 }
  0x30   : > { %s2378_s15 = scalar_select %p29_p1, %s2238_s26, %s31_s13  }
  0x31   : > { %p40_p12 = por %p39_p6, %p38_p2  ;;  %p2382_p7 = por %p2810_p3, %p38_p2 }
  0x32   : > { %s258_s12 = sand.u32 1, %s2238_s26   ;;  %s1776_s14 = sshll.u32 %s2242_s27, 11 }
  0x33   : > { %s2811_s16 = scalar_select %p2382_p7, 1, 0 }
  0x34   : > { %s1696_s17 = sshll.u32 %s258_s12, 7  ;;  %s2392_s20 = scalar_lea.hbm %s2792_s0, %s1776_s14 }
  0x35   : > { %s262_s21 = scalar_lea.vmem [#allocation2], %s1696_s17  ;;  %p2396_p11 = pnand %p1935_p9, %p40_p12 }
  0x36   : > { %s269_s22 = sshll.u32 %s262_s21, 4  ;;  %s2400_s29 = scalar_lea.sflag [#allocation3], %s258_s12  ;;  %s2394_s22 = int_to_ptr.vmem [resolvable:$true] %s269_s22 }
  0x37   : > { %s2146_s11 = scalar_lea.hbm %s2392_s20, 2048  ;;  %p2148_p0 = pneg %p2396_p11 }
  0x38   : > { %p2147_p13 = scmp.ne.s32.totalorder %s2392_s20, %s2146_s11  ;;  %s2151_s17 = scalar_lea.hbm %s2792_s0, 4096 }
  0x39   : > { %p2152_p1 = scmp.lt.s32.totalorder %s2392_s20, %s2792_s0  ;;  %p2153_p2 = scmp.lt.s32.totalorder %s2151_s17, %s2146_s11 }
  0x3a   : > { %p2149_p5 = pnand %p2148_p0, %p2147_p13 }
  0x3b   : > { %p2154_p6 = por %p2153_p2, %p2152_p1 }
  0x3c   : > { %p2150_p10 = pneg %p2149_p5 }
  0x3e   : > { %p2155_p12 = pnand %p2154_p6, %p2150_p10 }
  0x40   : > { %2158 = shalt.err (!%p2155_p12)
}
  0x41   : > { %s2159_s12 = scalar_lea.vmem %s2394_s22, 2048  ;;  %s2250_s21 = smov [#allocation2]  }
  0x42   : > { %p2160_p3 = scmp.ne.s32.totalorder %s2394_s22, %s2159_s12  ;;  %s2164_s3 = sshll.u32 %s2250_s21, 4  ;;  %s2165_s3 = int_to_ptr.vmem [resolvable:$false] %s2164_s3 }
  0x43   : > { %s2166_s13 = scalar_lea.vmem %s2165_s3, 4096  ;;  %p2167_p5 = scmp.lt.s32.totalorder %s2394_s22, %s2165_s3 }
  0x44   : > { %p2162_p9 = pnand %p2160_p3, %p2148_p0  ;;  %p2168_p7 = scmp.lt.s32.totalorder %s2166_s13, %s2159_s12 }
  0x46   : > { %p2163_p13 = pneg %p2162_p9  ;;  %p2169_p4 = por %p2168_p7, %p2167_p5 }
  0x48   : > { %p2170_p8 = pnand %p2169_p4, %p2163_p13 }
  0x4a   : > { %2173 = shalt.err (!%p2170_p8)
}
  0x4b   : > { %s2251_s11 = smov 128   ;;  %s2252_s14 = smov 8  }
  0x4c   : > { %1928 = dma.hbm_to_vmem [thread:$0]  (!%p2396_p11), %s2392_s20, 2048, %s2394_s22, %s2400_s29, %s2251_s11, %s2251_s11, %s2252_s14  }
  0x4d   : > { %p2813_p0 = scmp.ne.s32.totalorder %s2807_s9, 0 }
  0x4e   : > { %s2424_s17 = sand.u32 (!%p2813_p0), 1, %s2234_s25   ;;  %p2814_p4 = scmp.ne.s32.totalorder (!%p2813_p0), %s2805_s30, 0 }
  0x4f   : > { %281 = sbr.rel (%p2813_p0) target bundleno = 882 (0x372), region = 48  ;;  %s1700_s3 = sshll.u32 (!%p2813_p0), %s2424_s17, 7 }
  0x50   : > { %s284_s18 = scalar_lea.sflag (!%p2813_p0), [#allocation3], %s2424_s17  ;;  %s2430_s19 = scalar_lea.vmem (!%p2813_p0), [#allocation2], %s1700_s3 }
  0x54   : > { %2217 = dma.done.wait (%p2814_p4), %s284_s18, 2048  }
  0x55   : > { %2219 = vsyncadd (%p2814_p4), %s284_s18, 4294965248  ;;  %p2815_p8 = scmp.eq.s32.totalorder %s2318_s28, 0 }
  0x57   : > { %2221 = dma.done.wait (%p2815_p8), [#allocation6], 8192   ;;  %p2816_p7 = pmov %p2815_p8 }
  0x58   : > { %v329_v0 = vld [vmem:[%s2430_s19] sm:$0xff]  ;;  %v331_v1 = vld [vmem:[%s2430_s19 + $0x10] sm:$0xff]  ;;  %v330_v2 = vld [vmem:[%s2430_s19 + $0x8] sm:$0xff]  ;;  %s2709_s13 = scalar_lea.vmem [#allocation8], %s1700_s3  ;;  %s1777_s11 = sshll.u32 %s2318_s28, 11 }
  0x59   : > { %2223 = vsyncadd (%p2816_p7), [#allocation6], 4294959104  ;;  %347 = vadd.xlane.f32.xlu0 %v329_v0  ;;  %351 = vadd.xlane.f32.xlu1 %v331_v1  ;;  %v332_v3 = vld [vmem:[%s2430_s19 + $0x18] sm:$0xff]  ;;  %v333_v4 = vld [vmem:[%s2430_s19 + $0x20] sm:$0xff]  ;;  %s1599_s14 = sshll.u32 %s2709_s13, 4  ;;  %s1586_s30 = scalar_lea.sflag [#allocation4], %s2424_s17  ;;  %s2748_s14 = int_to_ptr.vmem [resolvable:$true] %s1599_s14 }
  0x5a   : > { %v334_v5 = vld [vmem:[%s2430_s19 + $0x28] sm:$0xff]  ;;  %v335_v6 = vld [vmem:[%s2430_s19 + $0x30] sm:$0xff]  ;;  %v336_v7 = vld [vmem:[%s2430_s19 + $0x38] sm:$0xff]  ;;  %s2174_s9 = scalar_lea.vmem %s2748_s14, 2048  ;;  %p2817_p10 = scmp.ne.s32.totalorder %s2811_s16, 0 }
  0x5b   : > { %v2449_v8 = vld [vmem:[%s2430_s19 + $0x40] sm:$0xff]  ;;  %v2452_v9 = vld [vmem:[%s2430_s19 + $0x48] sm:$0xff]  ;;  %v2455_v10 = vld [vmem:[%s2430_s19 + $0x50] sm:$0xff]  ;;  %p2175_p11 = scmp.ne.s32.totalorder %s2748_s14, %s2174_s9  ;;  %s2254_s28 = smov [#allocation8]  }
  0x5c   : > { %v2458_v11 = vld [vmem:[%s2430_s19 + $0x58] sm:$0xff]  ;;  %v2463_v12 = vld [vmem:[%s2430_s19 + $0x60] sm:$0xff]  ;;  %v2466_v13 = vld [vmem:[%s2430_s19 + $0x68] sm:$0xff]  ;;  %s2178_s20 = sshll.u32 %s2254_s28, 4  ;;  %s2179_s20 = int_to_ptr.vmem [resolvable:$false] %s2178_s20 }
  0x5d   : > { %349 = vadd.xlane.f32.xlu0 %v330_v2  ;;  %353 = vadd.xlane.f32.xlu1 %v332_v3  ;;  %v2471_v14 = vld [vmem:[%s2430_s19 + $0x70] sm:$0xff]  ;;  %v2474_v15 = vld [vmem:[%s2430_s19 + $0x78] sm:$0xff]  ;;  %s2746_s19 = scalar_lea.hbm %s2799_s7, %s1777_s11  ;;  %p2176_p1 = pnand %p2175_p11, %p2817_p10 }
  0x5e   : > { %v1982_v16 = vld [vmem:[#allocation5 + $0xe4] ss:$16 sps:$4 sm:$0xff]   ;;  %v1984_v17 = vld [vmem:[#allocation5 + $0xec] ss:$16 sps:$4 sm:$0xff]   ;;  %v1986_v18 = vld [vmem:[#allocation5 + $0xe0] ss:$16 sps:$4 sm:$0xff]   ;;  %p2181_p6 = scmp.lt.s32.totalorder %s2748_s14, %s2179_s20 }
  0x5f   : > { %v1987_v19 = vld [vmem:[#allocation5 + $0xe8] ss:$16 sps:$4 sm:$0xff]   ;;  %790 = vmatprep.subr.bf16.mxu0 %v1982_v16  ;;  %903 = vmatprep.subr.bf16.mxu1 %v1984_v17  ;;  %v1988_v55 = vld [vmem:[#allocation5 + $0xc4] ss:$16 sps:$4 sm:$0xff]   ;;  %v1990_v56 = vld [vmem:[#allocation5 + $0xcc] ss:$16 sps:$4 sm:$0xff]   ;;  %p2177_p2 = pneg %p2176_p1 }
  0x60   : > { %791 = vmatpush1.bf16.msra.mxu0 %v1986_v18  ;;  %904 = vmatpush1.bf16.msra.mxu1 %v1987_v19  ;;  %v1992_v57 = vld [vmem:[#allocation5 + $0xc0] ss:$16 sps:$4 sm:$0xff]   ;;  %v1993_v58 = vld [vmem:[#allocation5 + $0xc8] ss:$16 sps:$4 sm:$0xff]   ;;  %s2180_s22 = scalar_lea.vmem %s2179_s20, 4096 }
  0x61   : > { %355 = vadd.xlane.f32.xlu0 %v333_v4  ;;  %357 = vadd.xlane.f32.xlu1 %v334_v5  ;;  %p2182_p12 = scmp.lt.s32.totalorder %s2180_s22, %s2174_s9 }
  0x62   : > { %792 = vmatprep.subr.bf16.mxu0 %v1988_v55  ;;  %905 = vmatprep.subr.bf16.mxu1 %v1990_v56  ;;  %v2029_v55 = vld [vmem:[#allocation5 + $0x8] ss:$16 sps:$4 sm:$0xff]   ;;  %v2253_v56 = vmov 0  }
  0x63   : > { %822 = vmatprep.mubr.bf16.mxu0 %v2253_v56  ;;  %935 = vmatprep.mubr.bf16.mxu1 %v2253_v56  ;;  %p2183_p3 = por %p2182_p12, %p2181_p6 }
  0x64   : > { %793 = vmatpush1.bf16.msra.mxu0 %v1992_v57  ;;  %906 = vmatpush1.bf16.msra.mxu1 %v1993_v58  ;;  %v2030_v57 = vld [vmem:[#allocation7 + $0x78] sm:$0xff]  }
  0x65   : > { %359 = vadd.xlane.f32.xlu0 %v335_v6  ;;  %361 = vadd.xlane.f32.xlu1 %v336_v7  ;;  %v2032_v58 = vld [vmem:[#allocation7 + $0xf8] sm:$0xff]   ;;  %p2184_p9 = pnand %p2183_p3, %p2177_p2 }
  0x69   : > { %363 = vadd.xlane.f32.xlu0 %v2449_v8  ;;  %365 = vadd.xlane.f32.xlu1 %v2452_v9 }
  0x6d   : > { %367 = vadd.xlane.f32.xlu0 %v2455_v10  ;;  %369 = vadd.xlane.f32.xlu1 %v2458_v11 }
  0x71   : > { %371 = vadd.xlane.f32.xlu0 %v2463_v12  ;;  %373 = vadd.xlane.f32.xlu1 %v2466_v13 }
  0x75   : > { %375 = vadd.xlane.f32.xlu0 %v2471_v14  ;;  %377 = vadd.xlane.f32.xlu1 %v2474_v15 }
  0xe2   : > { %v348_v20 = vpop.xlane.xlu0 %347  ;;  %v352_v21 = vpop.xlane.xlu1 %351 }
  0xe3   : > { %v380_v22 = vmul.f32 0.0078125, %v348_v20  ;;  %v382_v23 = vmul.f32 0.0078125, %v352_v21  ;;  %v2000_v20 = vld [vmem:[#allocation5 + $0x84] ss:$16 sps:$4 sm:$0xff]   ;;  %v2002_v21 = vld [vmem:[#allocation5 + $0x8c] ss:$16 sps:$4 sm:$0xff]  }
  0xe5   : > { %v2480_v24 = vsub.f32 %v329_v0, %v380_v22  ;;  %v2482_v25 = vsub.f32 %v331_v1, %v382_v23 }
  0xe6   : > { %v350_v26 = vpop.xlane.xlu0 %349  ;;  %v354_v27 = vpop.xlane.xlu1 %353 }
  0xe7   : > { %v381_v28 = vmul.f32 0.0078125, %v350_v26  ;;  %v412_v29 = vmul.f32 %v2480_v24, %v2480_v24  ;;  %v383_v30 = vmul.f32 0.0078125, %v354_v27  ;;  %v414_v33 = vmul.f32 %v2482_v25, %v2482_v25  ;;  %v2004_v26 = vld [vmem:[#allocation5 + $0x80] ss:$16 sps:$4 sm:$0xff]   ;;  %v2005_v27 = vld [vmem:[#allocation5 + $0x88] ss:$16 sps:$4 sm:$0xff]  }
  0xe9   : > { %v2486_v31 = vsub.f32 %v330_v2, %v381_v28  ;;  %428 = vadd.xlane.f32.xlu0 %v412_v29  ;;  %v2488_v32 = vsub.f32 %v332_v3, %v383_v30  ;;  %v1994_v3 = vld [vmem:[#allocation5 + $0xa4] ss:$16 sps:$4 sm:$0xff]  }
  0xea   : > { %v356_v34 = vpop.xlane.xlu0 %355  ;;  %v358_v35 = vpop.xlane.xlu1 %357  ;;  %794 = vmatprep.subr.bf16.mxu0 %v1994_v3 }
  0xeb   : > { %v384_v36 = vmul.f32 0.0078125, %v356_v34  ;;  %v413_v37 = vmul.f32 %v2486_v31, %v2486_v31  ;;  %v385_v38 = vmul.f32 0.0078125, %v358_v35  ;;  %v415_v41 = vmul.f32 %v2488_v32, %v2488_v32  ;;  %v2006_v34 = vld [vmem:[#allocation5 + $0x64] ss:$16 sps:$4 sm:$0xff]   ;;  %v2008_v35 = vld [vmem:[#allocation5 + $0x6c] ss:$16 sps:$4 sm:$0xff]  }
  0xed   : > { %v2494_v39 = vsub.f32 %v333_v4, %v384_v36  ;;  %432 = vadd.xlane.f32.xlu0 %v414_v33  ;;  %430 = vadd.xlane.f32.xlu1 %v413_v37  ;;  %v2496_v40 = vsub.f32 %v334_v5, %v385_v38  ;;  %v1996_v4 = vld [vmem:[#allocation5 + $0xac] ss:$16 sps:$4 sm:$0xff]   ;;  %v2010_v38 = vld [vmem:[#allocation5 + $0x60] ss:$16 sps:$4 sm:$0xff]  }
  0xee   : > { %v360_v42 = vpop.xlane.xlu0 %359  ;;  %v362_v43 = vpop.xlane.xlu1 %361  ;;  %907 = vmatprep.subr.bf16.mxu1 %v1996_v4 }
  0xef   : > { %v386_v44 = vmul.f32 0.0078125, %v360_v42  ;;  %v416_v45 = vmul.f32 %v2494_v39, %v2494_v39  ;;  %v387_v46 = vmul.f32 0.0078125, %v362_v43  ;;  %v417_v49 = vmul.f32 %v2496_v40, %v2496_v40  ;;  %v2012_v43 = vld [vmem:[#allocation5 + $0x44] ss:$16 sps:$4 sm:$0xff]  }
  0xf1   : > { %v2502_v47 = vsub.f32 %v335_v6, %v386_v44  ;;  %434 = vadd.xlane.f32.xlu1 %v415_v41  ;;  %436 = vadd.xlane.f32.xlu0 %v416_v45  ;;  %v2504_v48 = vsub.f32 %v336_v7, %v387_v46  ;;  %v2011_v41 = vld [vmem:[#allocation5 + $0x68] ss:$16 sps:$4 sm:$0xff]   ;;  %v2016_v44 = vld [vmem:[#allocation5 + $0x40] ss:$16 sps:$4 sm:$0xff]   ;;  %v2018_v46 = vld [vmem:[#allocation5 + $0x24] ss:$16 sps:$4 sm:$0xff]  }
  0xf2   : > { %v364_v50 = vpop.xlane.xlu0 %363  ;;  %v366_v51 = vpop.xlane.xlu1 %365  ;;  %v2017_v45 = vld [vmem:[#allocation5 + $0x48] ss:$16 sps:$4 sm:$0xff]  }
  0xf3   : > { %v388_v52 = vmul.f32 0.0078125, %v364_v50  ;;  %v418_v53 = vmul.f32 %v2502_v47, %v2502_v47  ;;  %v389_v54 = vmul.f32 0.0078125, %v366_v51  ;;  %v419_v61 = vmul.f32 %v2504_v48, %v2504_v48  ;;  %v2022_v50 = vld [vmem:[#allocation5 + $0x20] ss:$16 sps:$4 sm:$0xff]   ;;  %v2023_v51 = vld [vmem:[#allocation5 + $0x28] ss:$16 sps:$4 sm:$0xff]  }
  0xf5   : > { %v2511_v59 = vsub.f32 %v2449_v8, %v388_v52  ;;  %438 = vadd.xlane.f32.xlu1 %v417_v49  ;;  %440 = vadd.xlane.f32.xlu0 %v418_v53  ;;  %v2514_v60 = vsub.f32 %v2452_v9, %v389_v54  ;;  %v1998_v8 = vld [vmem:[#allocation5 + $0xa0] ss:$16 sps:$4 sm:$0xff]   ;;  %v1999_v9 = vld [vmem:[#allocation5 + $0xa8] ss:$16 sps:$4 sm:$0xff]   ;;  %v2020_v49 = vld [vmem:[#allocation5 + $0x2c] ss:$16 sps:$4 sm:$0xff]  }
  0xf6   : > { %v368_v62 = vpop.xlane.xlu0 %367  ;;  %v370_v63 = vpop.xlane.xlu1 %369  ;;  %795 = vmatpush1.bf16.msra.mxu0 %v1998_v8  ;;  %908 = vmatpush1.bf16.msra.mxu1 %v1999_v9  ;;  %v2024_v52 = vld [vmem:[#allocation5 + $0x4] ss:$16 sps:$4 sm:$0xff]   ;;  %v2026_v53 = vld [vmem:[#allocation5 + $0xc] ss:$16 sps:$4 sm:$0xff]   ;;  %v2028_v54 = vld [vmem:[#allocation5] ss:$16 sps:$4 sm:$0xff]  }
  0xf7   : > { %v390_v0 = vmul.f32 0.0078125, %v368_v62  ;;  %v420_v1 = vmul.f32 %v2511_v59, %v2511_v59  ;;  %v391_v2 = vmul.f32 0.0078125, %v370_v63  ;;  %v421_v7 = vmul.f32 %v2514_v60, %v2514_v60  ;;  %796 = vmatprep.subr.bf16.mxu0 %v2000_v20  ;;  %909 = vmatprep.subr.bf16.mxu1 %v2002_v21 }
  0xf9   : > { %v2521_v5 = vsub.f32 %v2455_v10, %v390_v0  ;;  %442 = vadd.xlane.f32.xlu1 %v419_v61  ;;  %444 = vadd.xlane.f32.xlu0 %v420_v1  ;;  %v2524_v6 = vsub.f32 %v2458_v11, %v391_v2 }
  0xfa   : > { %v372_v16 = vpop.xlane.xlu0 %371  ;;  %v374_v17 = vpop.xlane.xlu1 %373  ;;  %797 = vmatpush1.bf16.msra.mxu0 %v2004_v26  ;;  %910 = vmatpush1.bf16.msra.mxu1 %v2005_v27 }
  0xfb   : > { %v392_v18 = vmul.f32 0.0078125, %v372_v16  ;;  %v422_v19 = vmul.f32 %v2521_v5, %v2521_v5  ;;  %v393_v10 = vmul.f32 0.0078125, %v374_v17  ;;  %v423_v23 = vmul.f32 %v2524_v6, %v2524_v6  ;;  %798 = vmatprep.subr.bf16.mxu0 %v2006_v34  ;;  %911 = vmatprep.subr.bf16.mxu1 %v2008_v35 }
  0xfd   : > { %v2531_v11 = vsub.f32 %v2463_v12, %v392_v18  ;;  %446 = vadd.xlane.f32.xlu1 %v421_v7  ;;  %448 = vadd.xlane.f32.xlu0 %v422_v19  ;;  %v2534_v22 = vsub.f32 %v2466_v13, %v393_v10 }
  0xfe   : > { %v376_v28 = vpop.xlane.xlu0 %375  ;;  %v378_v29 = vpop.xlane.xlu1 %377  ;;  %799 = vmatpush1.bf16.msra.mxu0 %v2010_v38  ;;  %912 = vmatpush1.bf16.msra.mxu1 %v2011_v41 }
  0xff   : > { %v394_v30 = vmul.f32 0.0078125, %v376_v28  ;;  %v424_v33 = vmul.f32 %v2531_v11, %v2531_v11  ;;  %v395_v12 = vmul.f32 0.0078125, %v378_v29  ;;  %v425_v37 = vmul.f32 %v2534_v22, %v2534_v22  ;;  %800 = vmatprep.subr.bf16.mxu0 %v2012_v43 }
 0x101   : > { %v2541_v13 = vsub.f32 %v2471_v14, %v394_v30  ;;  %450 = vadd.xlane.f32.xlu1 %v423_v23  ;;  %452 = vadd.xlane.f32.xlu0 %v424_v33  ;;  %v2544_v36 = vsub.f32 %v2474_v15, %v395_v12  ;;  %v2014_v14 = vld [vmem:[#allocation5 + $0x4c] ss:$16 sps:$4 sm:$0xff]   ;;  %v2558_v33 = vld [vmem:[%s2793_s1] ss:$0 sm:$0xff] }
 0x102   : > { %913 = vmatprep.subr.bf16.mxu1 %v2014_v14  ;;  %801 = vmatpush1.bf16.msra.mxu0 %v2016_v44  ;;  %v2565_v14 = vld [vmem:[%s2794_s2] ss:$0 sm:$0xff] }
 0x103   : > { %v426_v42 = vmul.f32 %v2541_v13, %v2541_v13  ;;  %v427_v15 = vmul.f32 %v2544_v36, %v2544_v36  ;;  %914 = vmatpush1.bf16.msra.mxu1 %v2017_v45  ;;  %802 = vmatprep.subr.bf16.mxu0 %v2018_v46 }
 0x104   : > { %915 = vmatprep.subr.bf16.mxu1 %v2020_v49 }
 0x105   : > { %454 = vadd.xlane.f32.xlu1 %v425_v37  ;;  %456 = vadd.xlane.f32.xlu0 %v426_v42 }
 0x106   : > { %803 = vmatpush1.bf16.msra.mxu0 %v2022_v50 }
 0x107   : > { %916 = vmatpush1.bf16.msra.mxu1 %v2023_v51  ;;  %804 = vmatprep.subr.bf16.mxu0 %v2024_v52 }
 0x108   : > { %917 = vmatprep.subr.bf16.mxu1 %v2026_v53  ;;  %v2031_v53 = vld [vmem:[#allocation7 + $0x38] sm:$0xff]  }
 0x109   : > { %458 = vadd.xlane.f32.xlu1 %v427_v15 }
 0x10a   : > { %805 = vmatpush1.bf16.msra.mxu0 %v2028_v54  ;;  %v2033_v54 = vld [vmem:[#allocation7 + $0xb8] sm:$0xff]  }
 0x10b   : > { %918 = vmatpush1.bf16.msra.mxu1 %v2029_v55  ;;  %1778 = vmatprep.subr.bf16.mxu0 %v2030_v57 }
 0x10c   : > { %1842 = vmatprep.subr.bf16.mxu1 %v2032_v58 }
 0x172   : > { %v429_v61 = vpop.xlane.xlu0 %428 }
 0x173   : > { %v460_v62 = vmul.f32 0.0078125, %v429_v61  ;;  %v2034_v61 = vld [vmem:[#allocation7 + $0x70] sm:$0xff]  }
 0x175   : > { %v476_v63 = vadd.f32 1e-05, %v460_v62  ;;  %v2036_v62 = vld [vmem:[#allocation7 + $0xf0] sm:$0xff]  }
 0x176   : > { %v431_v0 = vpop.xlane.xlu1 %430  ;;  %v433_v1 = vpop.xlane.xlu0 %432 }
 0x177   : > { %2062 = vrsqrt.f32 %v476_v63  ;;  %v461_v2 = vmul.f32 0.0078125, %v431_v0  ;;  %v462_v3 = vmul.f32 0.0078125, %v433_v1 }
 0x179   : > { %v477_v4 = vadd.f32 1e-05, %v461_v2  ;;  %v478_v7 = vadd.f32 1e-05, %v462_v3 }
 0x17a   : > { %v435_v8 = vpop.xlane.xlu1 %434  ;;  %v437_v9 = vpop.xlane.xlu0 %436 }
 0x17b   : > { %2064 = vrsqrt.f32 %v477_v4  ;;  %v463_v16 = vmul.f32 0.0078125, %v435_v8  ;;  %v464_v18 = vmul.f32 0.0078125, %v437_v9  ;;  %v2035_v4 = vld [vmem:[#allocation7 + $0x30] sm:$0xff]   ;;  %v2038_v8 = vld [vmem:[#allocation7 + $0x68] sm:$0xff]  }
 0x17c   : > { %2066 = vrsqrt.f32 %v478_v7  ;;  %v2037_v7 = vld [vmem:[#allocation7 + $0xb0] sm:$0xff]   ;;  %v2040_v9 = vld [vmem:[#allocation7 + $0xe8] sm:$0xff]  }
 0x17d   : > { %v479_v17 = vadd.f32 1e-05, %v463_v16  ;;  %v480_v20 = vadd.f32 1e-05, %v464_v18 }
 0x17e   : > { %v439_v19 = vpop.xlane.xlu1 %438  ;;  %v441_v23 = vpop.xlane.xlu0 %440 }
 0x17f   : > { %2068 = vrsqrt.f32 %v479_v17  ;;  %v465_v10 = vmul.f32 0.0078125, %v439_v19  ;;  %v466_v29 = vmul.f32 0.0078125, %v441_v23 }
 0x181   : > { %v481_v21 = vadd.f32 1e-05, %v465_v10  ;;  %v482_v35 = vadd.f32 1e-05, %v466_v29 }
 0x182   : > { %v443_v26 = vpop.xlane.xlu1 %442  ;;  %v445_v38 = vpop.xlane.xlu0 %444 }
 0x183   : > { %2070 = vrsqrt.f32 %v481_v21  ;;  %v467_v27 = vmul.f32 0.0078125, %v443_v26  ;;  %v468_v45 = vmul.f32 0.0078125, %v445_v38  ;;  %v2041_v21 = vld [vmem:[#allocation7 + $0xa8] sm:$0xff]   ;;  %v2043_v38 = vld [vmem:[#allocation7 + $0x20] sm:$0xff]  }
 0x184   : > { %v2063_v28 = vpop.eup %2062  ;;  %2072 = vrsqrt.f32 %v480_v20 }
 0x185   : > { %v508_v30 = vmul.f32 %v2063_v28, %v2480_v24  ;;  %v483_v12 = vadd.f32 1e-05, %v467_v27  ;;  %v484_v63 = vadd.f32 1e-05, %v468_v45  ;;  %v2042_v27 = vld [vmem:[#allocation7 + $0x60] sm:$0xff]  }
 0x186   : > { %v447_v37 = vpop.xlane.xlu1 %446  ;;  %v449_v2 = vpop.xlane.xlu0 %448  ;;  %v2044_v28 = vld [vmem:[#allocation7 + $0xe0] sm:$0xff]  }
 0x187   : > { %v530_v42 = vmul.f32 %v2558_v33, %v508_v30  ;;  %2074 = vrsqrt.f32 %v483_v12  ;;  %v469_v24 = vmul.f32 0.0078125, %v447_v37  ;;  %v470_v16 = vmul.f32 0.0078125, %v449_v2  ;;  %v2056_v2 = vld [vmem:[#allocation7 + $0xc8] sm:$0xff]  }
 0x188   : > { %v2065_v34 = vpop.eup %2064  ;;  %2076 = vrsqrt.f32 %v482_v35 }
 0x189   : > { %v509_v41 = vmul.f32 %v2065_v34, %v2486_v31  ;;  %v2067_v43 = vpop.eup %2066  ;;  %v552_v46 = vadd.f32 %v2565_v14, %v530_v42  ;;  %v485_v51 = vadd.f32 1e-05, %v469_v24  ;;  %v486_v30 = vadd.f32 1e-05, %v470_v16  ;;  %v2046_v42 = vld [vmem:[#allocation7 + $0x58] sm:$0xff]  }
 0x18a   : > { %v510_v31 = vmul.f32 %v2067_v43, %v2482_v25  ;;  %v451_v57 = vpop.xlane.xlu1 %450  ;;  %v453_v12 = vpop.xlane.xlu0 %452  ;;  %v2048_v43 = vld [vmem:[#allocation7 + $0xd8] sm:$0xff]  }
 0x18b   : > { %v531_v15 = vmul.f32 %v2558_v33, %v509_v41  ;;  %2078 = vrsqrt.f32 %v485_v51  ;;  %v471_v25 = vmul.f32 0.0078125, %v451_v57  ;;  %v2045_v41 = vld [vmem:[#allocation7 + $0xa0] sm:$0xff]   ;;  %v472_v24 = vmul.f32 0.0078125, %v453_v12 }
 0x18c   : > { %v2069_v44 = vpop.eup %2068  ;;  %v532_v0 = vmul.f32 %v2558_v33, %v510_v31  ;;  %2080 = vrsqrt.f32 %v484_v63  ;;  %v2049_v31 = vld [vmem:[#allocation7 + $0x98] sm:$0xff]   ;;  %v2051_v63 = vld [vmem:[#allocation7 + $0x10] sm:$0xff]  }
 0x18d   : > { %v553_v49 = vadd.f32 %v2565_v14, %v531_v15  ;;  %v511_v50 = vmul.f32 %v2069_v44, %v2488_v32  ;;  %v487_v19 = vadd.f32 1e-05, %v471_v25 }
 0x18e   : > { %v554_v17 = vadd.f32 %v2565_v14, %v532_v0  ;;  %v455_v26 = vpop.xlane.xlu1 %454  ;;  %v457_v57 = vpop.xlane.xlu0 %456  ;;  %v2053_v0 = vld [vmem:[#allocation7 + $0x90] sm:$0xff]  }
 0x18f   : > { %v568_v52 = vpack.c.bf16 %v553_v49, %v552_v46  ;;  %v533_v58 = vmul.f32 %v2558_v33, %v511_v50  ;;  %2082 = vrsqrt.f32 %v487_v19  ;;  %v473_v34 = vmul.f32 0.0078125, %v455_v26 }
 0x190   : > { %v2071_v55 = vpop.eup %2070  ;;  %2084 = vrsqrt.f32 %v486_v30  ;;  %v474_v25 = vmul.f32 0.0078125, %v457_v57 }
 0x191   : > { %823 = vmatmul.mubr.bf16.vlgmr.msra.gmra.mxu0 %v568_v52  ;;  %936 = vmatmul.mubr.bf16.vlgmr.msra.gmra.mxu1 %v568_v52  ;;  %v2073_v1 = vpop.eup %2072  ;;  %v555_v32 = vadd.f32 %v2565_v14, %v533_v58  ;;  %v513_v3 = vmul.f32 %v2071_v55, %v2496_v40  ;;  %v2039_v40 = vld [vmem:[#allocation7 + $0x28] sm:$0xff]   ;;  %v489_v45 = vadd.f32 1e-05, %v473_v34  ;;  %v2050_v52 = vld [vmem:[#allocation7 + $0x50] sm:$0xff]  }
 0x192   : > { %832 = vmatprep.mubr.bf16.mxu0 %v2253_v56  ;;  %945 = vmatprep.mubr.bf16.mxu1 %v2253_v56  ;;  %v512_v18 = vmul.f32 %v2073_v1, %v2494_v39  ;;  %v459_v51 = vpop.xlane.xlu1 %458  ;;  %v2054_v1 = vld [vmem:[#allocation7 + $0x48] sm:$0xff]   ;;  %v490_v16 = vadd.f32 1e-05, %v474_v25 }
 0x193   : > { %1779 = vmatpush3.bf16.msra.mxu0 %v2031_v53  ;;  %1843 = vmatpush3.bf16.msra.mxu1 %v2033_v54  ;;  %v569_v10 = vpack.c.bf16 %v555_v32, %v554_v17  ;;  %v535_v20 = vmul.f32 %v2558_v33, %v513_v3  ;;  %v2052_v53 = vld [vmem:[#allocation7 + $0xd0] sm:$0xff]   ;;  %v488_v54 = vadd.f32 1e-05, %v472_v24  ;;  %2086 = vrsqrt.f32 %v489_v45  ;;  %v2060_v45 = vld [vmem:[#allocation7 + $0xc0] sm:$0xff]  }
 0x194   : > { %1780 = vmatprep.subr.bf16.mxu0 %v2034_v61  ;;  %1844 = vmatprep.subr.bf16.mxu1 %v2036_v62  ;;  %v2075_v23 = vpop.eup %2074  ;;  %v534_v39 = vmul.f32 %v2558_v33, %v512_v18  ;;  %v475_v58 = vmul.f32 0.0078125, %v459_v51 }
 0x195   : > { %v2077_v29 = vpop.eup %2076  ;;  %v557_v35 = vadd.f32 %v2565_v14, %v535_v20  ;;  %v515_v37 = vmul.f32 %v2075_v23, %v2504_v48  ;;  %v2047_v48 = vld [vmem:[#allocation7 + $0x18] sm:$0xff]   ;;  %2088 = vrsqrt.f32 %v488_v54 }
 0x196   : > { %v556_v15 = vadd.f32 %v2565_v14, %v534_v39  ;;  %v514_v44 = vmul.f32 %v2077_v29, %v2502_v47 }
 0x197   : > { %1781 = vmatpush3.bf16.msra.mxu0 %v2035_v4  ;;  %1845 = vmatpush3.bf16.msra.mxu1 %v2037_v7  ;;  %v537_v49 = vmul.f32 %v2558_v33, %v515_v37  ;;  %v491_v4 = vadd.f32 1e-05, %v475_v58 }
 0x198   : > { %1782 = vmatprep.subr.bf16.mxu0 %v2038_v8  ;;  %1846 = vmatprep.subr.bf16.mxu1 %v2040_v9  ;;  %v570_v46 = vpack.c.bf16 %v557_v35, %v556_v15  ;;  %v2079_v50 = vpop.eup %2078  ;;  %v536_v55 = vmul.f32 %v2558_v33, %v514_v44  ;;  %v2057_v44 = vld [vmem:[#allocation7 + $0x88] sm:$0xff]  }
 0x199   : > { %833 = vmatmul.mubr.bf16.gmra.mxu0 %v569_v10  ;;  %946 = vmatmul.mubr.bf16.gmra.mxu1 %v569_v10  ;;  %v2081_v47 = vpop.eup %2080  ;;  %v559_v61 = vadd.f32 %v2565_v14, %v537_v49  ;;  %v517_v62 = vmul.f32 %v2079_v50, %v2514_v60  ;;  %v2055_v60 = vld [vmem:[#allocation7 + $0x8] sm:$0xff]   ;;  %2090 = vrsqrt.f32 %v491_v4  ;;  %v2061_v49 = vld [vmem:[#allocation7 + $0x80] sm:$0xff]  }
 0x19a   : > { %842 = vmatprep.mubr.bf16.mxu0 %v2253_v56  ;;  %955 = vmatprep.mubr.bf16.mxu1 %v2253_v56  ;;  %v558_v32 = vadd.f32 %v2565_v14, %v536_v55  ;;  %v516_v3 = vmul.f32 %v2081_v47, %v2511_v59  ;;  %2092 = vrsqrt.f32 %v490_v16 }
 0x19b   : > { %1783 = vmatpush3.bf16.msra.mxu0 %v2039_v40  ;;  %1847 = vmatpush3.bf16.msra.mxu1 %v2041_v21  ;;  %v539_v8 = vmul.f32 %v2558_v33, %v517_v62 }
 0x19c   : > { %1784 = vmatprep.subr.bf16.mxu0 %v2042_v27  ;;  %1848 = vmatprep.subr.bf16.mxu1 %v2044_v28  ;;  %v571_v7 = vpack.c.bf16 %v559_v61, %v558_v32  ;;  %v2083_v9 = vpop.eup %2082  ;;  %v538_v17 = vmul.f32 %v2558_v33, %v516_v3 }
 0x19d   : > { %v2085_v18 = vpop.eup %2084  ;;  %v561_v59 = vadd.f32 %v2565_v14, %v539_v8  ;;  %v519_v19 = vmul.f32 %v2083_v9, %v2524_v6 }
 0x19e   : > { %v560_v10 = vadd.f32 %v2565_v14, %v538_v17  ;;  %v518_v20 = vmul.f32 %v2085_v18, %v2521_v5 }
 0x19f   : > { %1785 = vmatpush3.bf16.msra.mxu0 %v2043_v38  ;;  %1849 = vmatpush3.bf16.msra.mxu1 %v2045_v41  ;;  %v541_v21 = vmul.f32 %v2558_v33, %v519_v19 }
 0x1a0   : > { %1786 = vmatprep.subr.bf16.mxu0 %v2046_v42  ;;  %1850 = vmatprep.subr.bf16.mxu1 %v2048_v43  ;;  %v572_v40 = vpack.c.bf16 %v561_v59, %v560_v10  ;;  %v2087_v23 = vpop.eup %2086  ;;  %v540_v26 = vmul.f32 %v2558_v33, %v518_v20 }
 0x1a1   : > { %843 = vmatmul.mubr.bf16.gmra.mxu0 %v570_v46  ;;  %956 = vmatmul.mubr.bf16.gmra.mxu1 %v570_v46  ;;  %v563_v6 = vadd.f32 %v2565_v14, %v541_v21  ;;  %v521_v28 = vmul.f32 %v2087_v23, %v2534_v22  ;;  %v2059_v46 = vld [vmem:[#allocation7] sm:$0xff]  }
 0x1a2   : > { %852 = vmatprep.mubr.bf16.mxu0 %v2253_v56  ;;  %965 = vmatprep.mubr.bf16.mxu1 %v2253_v56  ;;  %v2089_v27 = vpop.eup %2088  ;;  %v562_v29 = vadd.f32 %v2565_v14, %v540_v26 }
 0x1a3   : > { %1787 = vmatpush3.bf16.msra.mxu0 %v2047_v48  ;;  %1851 = vmatpush3.bf16.msra.mxu1 %v2049_v31  ;;  %v520_v5 = vmul.f32 %v2089_v27, %v2531_v11  ;;  %v543_v39 = vmul.f32 %v2558_v33, %v521_v28 }
 0x1a4   : > { %1788 = vmatprep.subr.bf16.mxu0 %v2050_v52  ;;  %1852 = vmatprep.subr.bf16.mxu1 %v2052_v53  ;;  %v573_v30 = vpack.c.bf16 %v563_v6, %v562_v29 }
 0x1a5   : > { %v542_v34 = vmul.f32 %v2558_v33, %v520_v5  ;;  %v565_v37 = vadd.f32 %v2565_v14, %v543_v39 }
 0x1a6   : > { %v2091_v12 = vpop.eup %2090 }
 0x1a7   : > { %1789 = vmatpush3.bf16.msra.mxu0 %v2051_v63  ;;  %1853 = vmatpush3.bf16.msra.mxu1 %v2053_v0  ;;  %v2093_v35 = vpop.eup %2092  ;;  %v523_v22 = vmul.f32 %v2091_v12, %v2544_v36  ;;  %v564_v38 = vadd.f32 %v2565_v14, %v542_v34 }
 0x1a8   : > { %1790 = vmatprep.subr.bf16.mxu0 %v2054_v1  ;;  %1854 = vmatprep.subr.bf16.mxu1 %v2056_v2  ;;  %v522_v11 = vmul.f32 %v2093_v35, %v2541_v13  ;;  %v2058_v13 = vld [vmem:[#allocation7 + $0x40] sm:$0xff]  }
 0x1a9   : > { %853 = vmatmul.mubr.bf16.gmra.mxu0 %v571_v7  ;;  %966 = vmatmul.mubr.bf16.gmra.mxu1 %v571_v7  ;;  %v574_v41 = vpack.c.bf16 %v565_v37, %v564_v38  ;;  %v545_v42 = vmul.f32 %v2558_v33, %v523_v22 }
 0x1aa   : > { %862 = vmatprep.mubr.bf16.mxu0 %v2253_v56  ;;  %975 = vmatprep.mubr.bf16.mxu1 %v2253_v56  ;;  %v544_v43 = vmul.f32 %v2558_v33, %v522_v11  ;;  %v610_v33 = vlaneseq }
 0x1ab   : > { %1791 = vmatpush3.bf16.msra.mxu0 %v2055_v60  ;;  %v567_v24 = vadd.f32 %v2565_v14, %v545_v42  ;;  %1855 = vmatpush3.bf16.msra.mxu1 %v2057_v44 }
 0x1ac   : > { %v566_v15 = vadd.f32 %v2565_v14, %v544_v43  ;;  %1792 = vmatprep.subr.bf16.mxu0 %v2058_v13  ;;  %1856 = vmatprep.subr.bf16.mxu1 %v2060_v45  ;;  %v611_v48 = vshrl.u32 %v610_v33, 7  ;;  %v608_v14 = vld [vmem:[%s2796_s4] sm:$0xf] }
 0x1ae   : > { %v575_v36 = vpack.c.bf16 %v567_v24, %v566_v15  ;;  %v624_v31 = vsub.s32 3, %v611_v48  ;;  %v612_v50 = vsub.s32 0, %v611_v48  ;;  %v620_v51 = vsub.s32 2, %v611_v48 }
 0x1af   : > { %1793 = vmatpush3.bf16.msra.mxu0 %v2059_v46  ;;  %1857 = vmatpush3.bf16.msra.mxu1 %v2061_v49 }
 0x1b0   : > { %v2631_v55 = vrot.slane %v608_v14, %v624_v31  ;;  %v2633_v47 = vrot.slane %v608_v14, %v612_v50  ;;  %v2635_v57 = vrot.slane %v608_v14, %v620_v51 }
 0x1b1   : > { %863 = vmatmul.mubr.bf16.gmra.mxu0 %v572_v40  ;;  %976 = vmatmul.mubr.bf16.gmra.mxu1 %v572_v40 }
 0x1b2   : > { %872 = vmatprep.mubr.bf16.mxu0 %v2253_v56  ;;  %985 = vmatprep.mubr.bf16.mxu1 %v2253_v56 }
 0x1b9   : > { %873 = vmatmul.mubr.bf16.gmra.mxu0 %v573_v30  ;;  %986 = vmatmul.mubr.bf16.gmra.mxu1 %v573_v30 }
 0x1ba   : > { %882 = vmatprep.mubr.bf16.mxu0 %v2253_v56  ;;  %995 = vmatprep.mubr.bf16.mxu1 %v2253_v56 }
 0x1c1   : > { %883 = vmatmul.mubr.bf16.gmra.mxu0 %v574_v41  ;;  %996 = vmatmul.mubr.bf16.gmra.mxu1 %v574_v41 }
 0x1c2   : > { %892 = vmatprep.mubr.bf16.mxu0 %v2253_v56  ;;  %1005 = vmatprep.mubr.bf16.mxu1 %v2253_v56  ;;  %v616_v56 = vsub.s32 1, %v611_v48 }
 0x1c4   : > { %v2629_v54 = vrot.slane %v608_v14, %v616_v56 }
 0x1c9   : > { %893 = vmatmul.mubr.bf16.gmra.mxu0 %v575_v36  ;;  %1006 = vmatmul.mubr.bf16.gmra.mxu1 %v575_v36 }
 0x251   : > { %v824_v52 = vpop.f32.mrf.mxu0  ;;  %v937_v53 = vpop.f32.mrf.mxu1 }
 0x252   : > { %v825_v32 = vadd.f32 %v824_v52, %v2633_v47  ;;  %v938_v3 = vadd.f32 %v937_v53, %v2635_v57 }
 0x253   : > { %v826_v58 = vpop.f32.mrf.mxu0  ;;  %v939_v61 = vpop.f32.mrf.mxu1 }
 0x254   : > { %v827_v0 = vadd.f32 %v826_v58, %v2629_v54  ;;  %v940_v1 = vadd.f32 %v939_v61, %v2631_v55  ;;  %v1016_v40 = vmax.f32 %v825_v32, 0.0  ;;  %v1018_v21 = vmax.f32 %v938_v3, 0.0 }
 0x255   : > { %v828_v62 = vpop.f32.mrf.mxu0  ;;  %v941_v63 = vpop.f32.mrf.mxu1 }
 0x256   : > { %v829_v2 = vadd.f32 %v828_v62, %v2633_v47  ;;  %v942_v25 = vadd.f32 %v941_v63, %v2635_v57  ;;  %v1017_v59 = vmax.f32 %v827_v0, 0.0  ;;  %v1019_v19 = vmax.f32 %v940_v1, 0.0 }
 0x257   : > { %v830_v4 = vpop.f32.mrf.mxu0  ;;  %v943_v7 = vpop.f32.mrf.mxu1 }
 0x258   : > { %v831_v8 = vadd.f32 %v830_v4, %v2629_v54  ;;  %v944_v60 = vadd.f32 %v943_v7, %v2631_v55  ;;  %v1020_v9 = vmax.f32 %v829_v2, 0.0  ;;  %v1022_v16 = vmax.f32 %v942_v25, 0.0 }
 0x259   : > { %v834_v17 = vpop.f32.mrf.mxu0  ;;  %v947_v18 = vpop.f32.mrf.mxu1 }
 0x25a   : > { %v1021_v10 = vmax.f32 %v831_v8, 0.0  ;;  %v1023_v20 = vmax.f32 %v944_v60, 0.0  ;;  %v1080_v28 = vpack.c.bf16 %v1020_v9, %v1016_v40  ;;  %v1082_v29 = vpack.c.bf16 %v1022_v16, %v1018_v21 }
 0x25b   : > { %v836_v23 = vpop.f32.mrf.mxu0  ;;  %v949_v26 = vpop.f32.mrf.mxu1  ;;  %v835_v37 = vadd.f32 %v834_v17, %v2633_v47  ;;  %v948_v22 = vadd.f32 %v947_v18, %v2635_v57 }
 0x25c   : > { %v1081_v27 = vpack.c.bf16 %v1021_v10, %v1017_v59  ;;  %v1083_v6 = vpack.c.bf16 %v1023_v20, %v1019_v19  ;;  %v837_v5 = vadd.f32 %v836_v23, %v2629_v54  ;;  %v950_v12 = vadd.f32 %v949_v26, %v2631_v55 }
 0x25d   : > { %v838_v30 = vpop.f32.mrf.mxu0  ;;  %v951_v39 = vpop.f32.mrf.mxu1  ;;  %v1024_v49 = vmax.f32 %v835_v37, 0.0  ;;  %v1026_v33 = vmax.f32 %v948_v22, 0.0 }
 0x25e   : > { %v839_v34 = vadd.f32 %v838_v30, %v2633_v47  ;;  %v952_v35 = vadd.f32 %v951_v39, %v2635_v57  ;;  %1407 = vmatprep.mubr.bf16.mxu0 %v1081_v27  ;;  %1504 = vmatprep.mubr.bf16.mxu1 %v1083_v6  ;;  %v1025_v44 = vmax.f32 %v837_v5, 0.0  ;;  %v1027_v13 = vmax.f32 %v950_v12, 0.0 }
 0x25f   : > { %v840_v38 = vpop.f32.mrf.mxu0  ;;  %v953_v11 = vpop.f32.mrf.mxu1  ;;  %1408 = vmatmul.mubr.bf16.vlgmr.msra.gmra.mxu0 %v1080_v28  ;;  %1505 = vmatmul.mubr.bf16.vlgmr.msra.gmra.mxu1 %v1082_v29 }
 0x260   : > { %v841_v41 = vadd.f32 %v840_v38, %v2629_v54  ;;  %v954_v42 = vadd.f32 %v953_v11, %v2631_v55  ;;  %v1028_v43 = vmax.f32 %v839_v34, 0.0  ;;  %v1030_v24 = vmax.f32 %v952_v35, 0.0 }
 0x261   : > { %v844_v15 = vpop.f32.mrf.mxu0  ;;  %v957_v36 = vpop.f32.mrf.mxu1 }
 0x262   : > { %v1029_v45 = vmax.f32 %v841_v41, 0.0  ;;  %v1031_v46 = vmax.f32 %v954_v42, 0.0  ;;  %v1084_v51 = vpack.c.bf16 %v1028_v43, %v1024_v49  ;;  %v1086_v14 = vpack.c.bf16 %v1030_v24, %v1026_v33 }
 0x263   : > { %v846_v48 = vpop.f32.mrf.mxu0  ;;  %v959_v56 = vpop.f32.mrf.mxu1  ;;  %v845_v0 = vadd.f32 %v844_v15, %v2633_v47  ;;  %v958_v1 = vadd.f32 %v957_v36, %v2635_v57 }
 0x264   : > { %v1085_v31 = vpack.c.bf16 %v1029_v45, %v1025_v44  ;;  %v1087_v50 = vpack.c.bf16 %v1031_v46, %v1027_v13  ;;  %v847_v52 = vadd.f32 %v846_v48, %v2629_v54  ;;  %v960_v61 = vadd.f32 %v959_v56, %v2631_v55 }
 0x265   : > { %v848_v53 = vpop.f32.mrf.mxu0  ;;  %v961_v58 = vpop.f32.mrf.mxu1  ;;  %v1032_v59 = vmax.f32 %v845_v0, 0.0  ;;  %v1034_v19 = vmax.f32 %v958_v1, 0.0 }
 0x266   : > { %v849_v62 = vadd.f32 %v848_v53, %v2633_v47  ;;  %v962_v63 = vadd.f32 %v961_v58, %v2635_v57  ;;  %1415 = vmatprep.mubr.bf16.mxu0 %v1085_v31  ;;  %1512 = vmatprep.mubr.bf16.mxu1 %v1087_v50  ;;  %v1033_v9 = vmax.f32 %v847_v52, 0.0  ;;  %v1035_v16 = vmax.f32 %v960_v61, 0.0 }
 0x267   : > { %v850_v2 = vpop.f32.mrf.mxu0  ;;  %v963_v25 = vpop.f32.mrf.mxu1  ;;  %1416 = vmatmul.mubr.bf16.gmra.mxu0 %v1084_v51  ;;  %1513 = vmatmul.mubr.bf16.gmra.mxu1 %v1086_v14 }
 0x268   : > { %v851_v32 = vadd.f32 %v850_v2, %v2629_v54  ;;  %v964_v3 = vadd.f32 %v963_v25, %v2631_v55  ;;  %v1036_v4 = vmax.f32 %v849_v62, 0.0  ;;  %v1038_v7 = vmax.f32 %v962_v63, 0.0 }
 0x269   : > { %v854_v8 = vpop.f32.mrf.mxu0  ;;  %v967_v60 = vpop.f32.mrf.mxu1 }
 0x26a   : > { %v1037_v17 = vmax.f32 %v851_v32, 0.0  ;;  %v1039_v18 = vmax.f32 %v964_v3, 0.0  ;;  %v1088_v23 = vpack.c.bf16 %v1036_v4, %v1032_v59  ;;  %v1090_v26 = vpack.c.bf16 %v1038_v7, %v1034_v19 }
 0x26b   : > { %v856_v10 = vpop.f32.mrf.mxu0  ;;  %v969_v20 = vpop.f32.mrf.mxu1  ;;  %v855_v39 = vadd.f32 %v854_v8, %v2633_v47  ;;  %v968_v12 = vadd.f32 %v967_v60, %v2635_v57 }
 0x26c   : > { %v1089_v40 = vpack.c.bf16 %v1037_v17, %v1033_v9  ;;  %v1091_v21 = vpack.c.bf16 %v1039_v18, %v1035_v16  ;;  %v857_v27 = vadd.f32 %v856_v10, %v2629_v54  ;;  %v970_v29 = vadd.f32 %v969_v20, %v2631_v55 }
 0x26d   : > { %v858_v6 = vpop.f32.mrf.mxu0  ;;  %v971_v28 = vpop.f32.mrf.mxu1  ;;  %v1040_v44 = vmax.f32 %v855_v39, 0.0  ;;  %v1042_v13 = vmax.f32 %v968_v12, 0.0 }
 0x26e   : > { %v859_v5 = vadd.f32 %v858_v6, %v2633_v47  ;;  %v972_v30 = vadd.f32 %v971_v28, %v2635_v57  ;;  %1423 = vmatprep.mubr.bf16.mxu0 %v1089_v40  ;;  %1520 = vmatprep.mubr.bf16.mxu1 %v1091_v21  ;;  %v1041_v43 = vmax.f32 %v857_v27, 0.0  ;;  %v1043_v24 = vmax.f32 %v970_v29, 0.0 }
 0x26f   : > { %v860_v34 = vpop.f32.mrf.mxu0  ;;  %v973_v35 = vpop.f32.mrf.mxu1  ;;  %1424 = vmatmul.mubr.bf16.gmra.mxu0 %v1088_v23  ;;  %1521 = vmatmul.mubr.bf16.gmra.mxu1 %v1090_v26 }
 0x270   : > { %v861_v37 = vadd.f32 %v860_v34, %v2629_v54  ;;  %v974_v22 = vadd.f32 %v973_v35, %v2631_v55  ;;  %v1044_v38 = vmax.f32 %v859_v5, 0.0  ;;  %v1046_v11 = vmax.f32 %v972_v30, 0.0 }
 0x271   : > { %v864_v41 = vpop.f32.mrf.mxu0  ;;  %v977_v42 = vpop.f32.mrf.mxu1 }
 0x272   : > { %v1045_v15 = vmax.f32 %v861_v37, 0.0  ;;  %v1047_v36 = vmax.f32 %v974_v22, 0.0  ;;  %v1092_v48 = vpack.c.bf16 %v1044_v38, %v1040_v44  ;;  %v1094_v56 = vpack.c.bf16 %v1046_v11, %v1042_v13 }
 0x273   : > { %v866_v45 = vpop.f32.mrf.mxu0  ;;  %v979_v46 = vpop.f32.mrf.mxu1  ;;  %v865_v58 = vadd.f32 %v864_v41, %v2633_v47  ;;  %v978_v61 = vadd.f32 %v977_v42, %v2635_v57 }
 0x274   : > { %v1093_v49 = vpack.c.bf16 %v1045_v15, %v1041_v43  ;;  %v1095_v33 = vpack.c.bf16 %v1047_v36, %v1043_v24  ;;  %v867_v31 = vadd.f32 %v866_v45, %v2629_v54  ;;  %v980_v14 = vadd.f32 %v979_v46, %v2631_v55 }
 0x275   : > { %v868_v50 = vpop.f32.mrf.mxu0  ;;  %v981_v51 = vpop.f32.mrf.mxu1  ;;  %v1048_v9 = vmax.f32 %v865_v58, 0.0  ;;  %v1050_v16 = vmax.f32 %v978_v61, 0.0 }
 0x276   : > { %v869_v52 = vadd.f32 %v868_v50, %v2633_v47  ;;  %v982_v53 = vadd.f32 %v981_v51, %v2635_v57  ;;  %1431 = vmatprep.mubr.bf16.mxu0 %v1093_v49  ;;  %1528 = vmatprep.mubr.bf16.mxu1 %v1095_v33  ;;  %v1049_v4 = vmax.f32 %v867_v31, 0.0  ;;  %v1051_v7 = vmax.f32 %v980_v14, 0.0 }
 0x277   : > { %v870_v62 = vpop.f32.mrf.mxu0  ;;  %v983_v63 = vpop.f32.mrf.mxu1  ;;  %1432 = vmatmul.mubr.bf16.gmra.mxu0 %v1092_v48  ;;  %1529 = vmatmul.mubr.bf16.gmra.mxu1 %v1094_v56 }
 0x278   : > { %v871_v0 = vadd.f32 %v870_v62, %v2629_v54  ;;  %v984_v1 = vadd.f32 %v983_v63, %v2631_v55  ;;  %v1052_v2 = vmax.f32 %v869_v52, 0.0  ;;  %v1054_v25 = vmax.f32 %v982_v53, 0.0 }
 0x279   : > { %v874_v32 = vpop.f32.mrf.mxu0  ;;  %v987_v3 = vpop.f32.mrf.mxu1 }
 0x27a   : > { %v1053_v8 = vmax.f32 %v871_v0, 0.0  ;;  %v1055_v60 = vmax.f32 %v984_v1, 0.0  ;;  %v1096_v10 = vpack.c.bf16 %v1052_v2, %v1048_v9  ;;  %v1098_v20 = vpack.c.bf16 %v1054_v25, %v1050_v16 }
 0x27b   : > { %v876_v17 = vpop.f32.mrf.mxu0  ;;  %v989_v18 = vpop.f32.mrf.mxu1  ;;  %v875_v28 = vadd.f32 %v874_v32, %v2633_v47  ;;  %v988_v29 = vadd.f32 %v987_v3, %v2635_v57 }
 0x27c   : > { %v1097_v59 = vpack.c.bf16 %v1053_v8, %v1049_v4  ;;  %v1099_v19 = vpack.c.bf16 %v1055_v60, %v1051_v7  ;;  %v877_v40 = vadd.f32 %v876_v17, %v2629_v54  ;;  %v990_v26 = vadd.f32 %v989_v18, %v2631_v55 }
 0x27d   : > { %v878_v21 = vpop.f32.mrf.mxu0  ;;  %v991_v23 = vpop.f32.mrf.mxu1  ;;  %v1056_v43 = vmax.f32 %v875_v28, 0.0  ;;  %v1058_v24 = vmax.f32 %v988_v29, 0.0 }
 0x27e   : > { %v879_v27 = vadd.f32 %v878_v21, %v2633_v47  ;;  %v992_v6 = vadd.f32 %v991_v23, %v2635_v57  ;;  %1439 = vmatprep.mubr.bf16.mxu0 %v1097_v59  ;;  %1536 = vmatprep.mubr.bf16.mxu1 %v1099_v19  ;;  %v1057_v38 = vmax.f32 %v877_v40, 0.0  ;;  %v1059_v11 = vmax.f32 %v990_v26, 0.0 }
 0x27f   : > { %v880_v5 = vpop.f32.mrf.mxu0  ;;  %v993_v30 = vpop.f32.mrf.mxu1  ;;  %1440 = vmatmul.mubr.bf16.gmra.mxu0 %v1096_v10  ;;  %1537 = vmatmul.mubr.bf16.gmra.mxu1 %v1098_v20 }
 0x280   : > { %v881_v39 = vadd.f32 %v880_v5, %v2629_v54  ;;  %v994_v12 = vadd.f32 %v993_v30, %v2631_v55  ;;  %v1060_v34 = vmax.f32 %v879_v27, 0.0  ;;  %v1062_v35 = vmax.f32 %v992_v6, 0.0 }
 0x281   : > { %v884_v37 = vpop.f32.mrf.mxu0  ;;  %v997_v22 = vpop.f32.mrf.mxu1 }
 0x282   : > { %v1061_v41 = vmax.f32 %v881_v39, 0.0  ;;  %v1063_v42 = vmax.f32 %v994_v12, 0.0  ;;  %v1100_v45 = vpack.c.bf16 %v1060_v34, %v1056_v43  ;;  %v1102_v46 = vpack.c.bf16 %v1062_v35, %v1058_v24 }
 0x283   : > { %v886_v15 = vpop.f32.mrf.mxu0  ;;  %v999_v36 = vpop.f32.mrf.mxu1  ;;  %v885_v51 = vadd.f32 %v884_v37, %v2633_v47  ;;  %v998_v14 = vadd.f32 %v997_v22, %v2635_v57 }
 0x284   : > { %v1101_v44 = vpack.c.bf16 %v1061_v41, %v1057_v38  ;;  %v1103_v13 = vpack.c.bf16 %v1063_v42, %v1059_v11  ;;  %v887_v49 = vadd.f32 %v886_v15, %v2629_v54  ;;  %v1000_v56 = vadd.f32 %v999_v36, %v2631_v55 }
 0x285   : > { %v888_v33 = vpop.f32.mrf.mxu0  ;;  %v1001_v48 = vpop.f32.mrf.mxu1  ;;  %v1064_v4 = vmax.f32 %v885_v51, 0.0  ;;  %v1066_v7 = vmax.f32 %v998_v14, 0.0 }
 0x286   : > { %v889_v31 = vadd.f32 %v888_v33, %v2633_v47  ;;  %v1002_v50 = vadd.f32 %v1001_v48, %v2635_v57  ;;  %1447 = vmatprep.mubr.bf16.mxu0 %v1101_v44  ;;  %1544 = vmatprep.mubr.bf16.mxu1 %v1103_v13  ;;  %v1065_v2 = vmax.f32 %v887_v49, 0.0  ;;  %v1067_v25 = vmax.f32 %v1000_v56, 0.0 }
 0x287   : > { %v890_v52 = vpop.f32.mrf.mxu0  ;;  %v1003_v53 = vpop.f32.mrf.mxu1  ;;  %1448 = vmatmul.mubr.bf16.gmra.mxu0 %v1100_v45  ;;  %1545 = vmatmul.mubr.bf16.gmra.mxu1 %v1102_v46 }
 0x288   : > { %v891_v58 = vadd.f32 %v890_v52, %v2629_v54  ;;  %v1004_v61 = vadd.f32 %v1003_v53, %v2631_v55  ;;  %v1068_v62 = vmax.f32 %v889_v31, 0.0  ;;  %v1070_v63 = vmax.f32 %v1002_v50, 0.0 }
 0x289   : > { %v894_v0 = vpop.f32.mrf.mxu0  ;;  %v1007_v1 = vpop.f32.mrf.mxu1 }
 0x28a   : > { %v1069_v32 = vmax.f32 %v891_v58, 0.0  ;;  %v1071_v3 = vmax.f32 %v1004_v61, 0.0  ;;  %v1104_v17 = vpack.c.bf16 %v1068_v62, %v1064_v4  ;;  %v1106_v18 = vpack.c.bf16 %v1070_v63, %v1066_v7 }
 0x28b   : > { %v896_v8 = vpop.f32.mrf.mxu0  ;;  %v1009_v60 = vpop.f32.mrf.mxu1  ;;  %v895_v23 = vadd.f32 %v894_v0, %v2633_v47  ;;  %v1008_v26 = vadd.f32 %v1007_v1, %v2635_v57 }
 0x28c   : > { %v1105_v9 = vpack.c.bf16 %v1069_v32, %v1065_v2  ;;  %v1107_v16 = vpack.c.bf16 %v1071_v3, %v1067_v25  ;;  %v897_v59 = vadd.f32 %v896_v8, %v2629_v54  ;;  %v1010_v20 = vadd.f32 %v1009_v60, %v2631_v55 }
 0x28d   : > { %v898_v19 = vpop.f32.mrf.mxu0  ;;  %v1011_v10 = vpop.f32.mrf.mxu1  ;;  %v1072_v37 = vmax.f32 %v895_v23, 0.0  ;;  %v1074_v22 = vmax.f32 %v1008_v26, 0.0 }
 0x28e   : > { %v899_v40 = vadd.f32 %v898_v19, %v2633_v47  ;;  %v1012_v21 = vadd.f32 %v1011_v10, %v2635_v57  ;;  %1455 = vmatprep.mubr.bf16.mxu0 %v1105_v9  ;;  %1552 = vmatprep.mubr.bf16.mxu1 %v1107_v16  ;;  %v1073_v39 = vmax.f32 %v897_v59, 0.0  ;;  %v1075_v12 = vmax.f32 %v1010_v20, 0.0 }
 0x28f   : > { %v900_v27 = vpop.f32.mrf.mxu0  ;;  %v1013_v6 = vpop.f32.mrf.mxu1  ;;  %1456 = vmatmul.mubr.bf16.gmra.mxu0 %v1104_v17  ;;  %1553 = vmatmul.mubr.bf16.gmra.mxu1 %v1106_v18 }
 0x290   : > { %v901_v28 = vadd.f32 %v900_v27, %v2629_v54  ;;  %v1014_v29 = vadd.f32 %v1013_v6, %v2631_v55  ;;  %v1076_v5 = vmax.f32 %v899_v40, 0.0  ;;  %v1078_v30 = vmax.f32 %v1012_v21, 0.0  ;;  %v2704_v55 = vld [vmem:[%s2798_s6] ss:$0 sm:$0xff] }
 0x292   : > { %v1077_v34 = vmax.f32 %v901_v28, 0.0  ;;  %v1079_v35 = vmax.f32 %v1014_v29, 0.0  ;;  %v1108_v11 = vpack.c.bf16 %v1076_v5, %v1072_v37  ;;  %v1110_v57 = vpack.c.bf16 %v1078_v30, %v1074_v22 }
 0x294   : > { %v1109_v38 = vpack.c.bf16 %v1077_v34, %v1073_v39  ;;  %v1111_v47 = vpack.c.bf16 %v1079_v35, %v1075_v12 }
 0x296   : > { %1463 = vmatprep.mubr.bf16.mxu0 %v1109_v38  ;;  %1560 = vmatprep.mubr.bf16.mxu1 %v1111_v47 }
 0x297   : > { %1464 = vmatmul.mubr.bf16.gmra.mxu0 %v1108_v11  ;;  %1561 = vmatmul.mubr.bf16.gmra.mxu1 %v1110_v57 }
 0x31f   : > { %v1794_v41 = vpop.f32.mrf.mxu0  ;;  %v1858_v54 = vpop.f32.mrf.mxu1 }
 0x321   : > { %v1795_v42 = vpop.f32.mrf.mxu0  ;;  %v1859_v43 = vpop.f32.mrf.mxu1 }
 0x322   : > { %v1796_v24 = vadd.f32 %v1795_v42, %v1794_v41  ;;  %v1860_v13 = vadd.f32 %v1859_v43, %v1858_v54 }
 0x323   : > { %v1797_v15 = vpop.f32.mrf.mxu0  ;;  %v1861_v36 = vpop.f32.mrf.mxu1 }
 0x324   : > { %v1410_v44 = vadd.f32 %v1796_v24, %v2704_v55 }
 0x325   : > { %v1798_v45 = vpop.f32.mrf.mxu0  ;;  %v1862_v46 = vpop.f32.mrf.mxu1 }
 0x326   : > { %v1507_v49 = vadd.f32 %v1860_v13, %v1410_v44  ;;  %v1799_v33 = vadd.f32 %v1798_v45, %v1797_v15  ;;  %v1863_v50 = vadd.f32 %v1862_v46, %v1861_v36 }
 0x327   : > { %v1800_v48 = vpop.f32.mrf.mxu0  ;;  %v1864_v56 = vpop.f32.mrf.mxu1 }
 0x328   : > { %1569 = vst [vmem:[%s2709_s13] sm:$0xff] %v1507_v49  ;;  %v1413_v31 = vadd.f32 %v1799_v33, %v2704_v55 }
 0x329   : > { %v1801_v51 = vpop.f32.mrf.mxu0  ;;  %v1865_v14 = vpop.f32.mrf.mxu1 }
 0x32a   : > { %v1510_v52 = vadd.f32 %v1863_v50, %v1413_v31  ;;  %v1802_v53 = vadd.f32 %v1801_v51, %v1800_v48  ;;  %v1866_v63 = vadd.f32 %v1865_v14, %v1864_v56 }
 0x32b   : > { %v1803_v58 = vpop.f32.mrf.mxu0  ;;  %v1867_v61 = vpop.f32.mrf.mxu1 }
 0x32c   : > { %1570 = vst [vmem:[%s2709_s13 + $0x8] sm:$0xff] %v1510_v52  ;;  %v1418_v62 = vadd.f32 %v1802_v53, %v2704_v55 }
 0x32d   : > { %v1804_v0 = vpop.f32.mrf.mxu0  ;;  %v1868_v1 = vpop.f32.mrf.mxu1 }
 0x32e   : > { %v1515_v2 = vadd.f32 %v1866_v63, %v1418_v62  ;;  %v1805_v25 = vadd.f32 %v1804_v0, %v1803_v58  ;;  %v1869_v7 = vadd.f32 %v1868_v1, %v1867_v61 }
 0x32f   : > { %v1806_v32 = vpop.f32.mrf.mxu0  ;;  %v1870_v3 = vpop.f32.mrf.mxu1 }
 0x330   : > { %1571 = vst [vmem:[%s2709_s13 + $0x10] sm:$0xff] %v1515_v2  ;;  %v1421_v4 = vadd.f32 %v1805_v25, %v2704_v55 }
 0x331   : > { %v1807_v8 = vpop.f32.mrf.mxu0  ;;  %v1871_v60 = vpop.f32.mrf.mxu1 }
 0x332   : > { %v1518_v9 = vadd.f32 %v1869_v7, %v1421_v4  ;;  %v1808_v16 = vadd.f32 %v1807_v8, %v1806_v32  ;;  %v1872_v19 = vadd.f32 %v1871_v60, %v1870_v3 }
 0x333   : > { %v1809_v17 = vpop.f32.mrf.mxu0  ;;  %v1873_v18 = vpop.f32.mrf.mxu1 }
 0x334   : > { %1572 = vst [vmem:[%s2709_s13 + $0x18] sm:$0xff] %v1518_v9  ;;  %v1426_v59 = vadd.f32 %v1808_v16, %v2704_v55 }
 0x335   : > { %v1810_v10 = vpop.f32.mrf.mxu0  ;;  %v1874_v20 = vpop.f32.mrf.mxu1 }
 0x336   : > { %v1523_v40 = vadd.f32 %v1872_v19, %v1426_v59  ;;  %v1811_v21 = vadd.f32 %v1810_v10, %v1809_v17  ;;  %v1875_v6 = vadd.f32 %v1874_v20, %v1873_v18 }
 0x337   : > { %v1812_v23 = vpop.f32.mrf.mxu0  ;;  %v1876_v26 = vpop.f32.mrf.mxu1 }
 0x338   : > { %1573 = vst [vmem:[%s2709_s13 + $0x20] sm:$0xff] %v1523_v40  ;;  %v1429_v27 = vadd.f32 %v1811_v21, %v2704_v55 }
 0x339   : > { %v1813_v28 = vpop.f32.mrf.mxu0  ;;  %v1877_v29 = vpop.f32.mrf.mxu1 }
 0x33a   : > { %v1526_v5 = vadd.f32 %v1875_v6, %v1429_v27  ;;  %v1814_v30 = vadd.f32 %v1813_v28, %v1812_v23  ;;  %v1878_v35 = vadd.f32 %v1877_v29, %v1876_v26 }
 0x33b   : > { %v1815_v39 = vpop.f32.mrf.mxu0  ;;  %v1879_v12 = vpop.f32.mrf.mxu1 }
 0x33c   : > { %1574 = vst [vmem:[%s2709_s13 + $0x28] sm:$0xff] %v1526_v5  ;;  %v1434_v34 = vadd.f32 %v1814_v30, %v2704_v55 }
 0x33d   : > { %v1816_v37 = vpop.f32.mrf.mxu0  ;;  %v1880_v22 = vpop.f32.mrf.mxu1 }
 0x33e   : > { %v1531_v38 = vadd.f32 %v1878_v35, %v1434_v34  ;;  %v1817_v47 = vadd.f32 %v1816_v37, %v1815_v39  ;;  %v1881_v54 = vadd.f32 %v1880_v22, %v1879_v12 }
 0x33f   : > { %v1818_v11 = vpop.f32.mrf.mxu0  ;;  %v1882_v57 = vpop.f32.mrf.mxu1 }
 0x340   : > { %1575 = vst [vmem:[%s2709_s13 + $0x30] sm:$0xff] %v1531_v38  ;;  %v1437_v41 = vadd.f32 %v1817_v47, %v2704_v55 }
 0x341   : > { %v1819_v42 = vpop.f32.mrf.mxu0  ;;  %v1883_v43 = vpop.f32.mrf.mxu1 }
 0x342   : > { %v1534_v24 = vadd.f32 %v1881_v54, %v1437_v41  ;;  %v1820_v15 = vadd.f32 %v1819_v42, %v1818_v11  ;;  %v1884_v45 = vadd.f32 %v1883_v43, %v1882_v57 }
 0x343   : > { %v1821_v36 = vpop.f32.mrf.mxu0  ;;  %v1885_v44 = vpop.f32.mrf.mxu1 }
 0x344   : > { %1576 = vst [vmem:[%s2709_s13 + $0x38] sm:$0xff] %v1534_v24  ;;  %v1442_v13 = vadd.f32 %v1820_v15, %v2704_v55 }
 0x345   : > { %v1822_v46 = vpop.f32.mrf.mxu0  ;;  %v1886_v49 = vpop.f32.mrf.mxu1 }
 0x346   : > { %v1539_v33 = vadd.f32 %v1884_v45, %v1442_v13  ;;  %v1823_v48 = vadd.f32 %v1822_v46, %v1821_v36  ;;  %v1887_v51 = vadd.f32 %v1886_v49, %v1885_v44 }
 0x347   : > { %v1824_v56 = vpop.f32.mrf.mxu0  ;;  %v1888_v31 = vpop.f32.mrf.mxu1 }
 0x348   : > { %1577 = vst [vmem:[%s2709_s13 + $0x40] sm:$0xff] %v1539_v33  ;;  %v1445_v50 = vadd.f32 %v1823_v48, %v2704_v55 }
 0x349   : > { %v1825_v14 = vpop.f32.mrf.mxu0  ;;  %v1889_v52 = vpop.f32.mrf.mxu1 }
 0x34a   : > { %v1542_v53 = vadd.f32 %v1887_v51, %v1445_v50  ;;  %v1826_v58 = vadd.f32 %v1825_v14, %v1824_v56  ;;  %v1890_v0 = vadd.f32 %v1889_v52, %v1888_v31 }
 0x34b   : > { %v1827_v61 = vpop.f32.mrf.mxu0  ;;  %v1891_v62 = vpop.f32.mrf.mxu1 }
 0x34c   : > { %1578 = vst [vmem:[%s2709_s13 + $0x48] sm:$0xff] %v1542_v53  ;;  %v1450_v63 = vadd.f32 %v1826_v58, %v2704_v55 }
 0x34d   : > { %v1828_v1 = vpop.f32.mrf.mxu0  ;;  %v1892_v2 = vpop.f32.mrf.mxu1 }
 0x34e   : > { %v1547_v25 = vadd.f32 %v1890_v0, %v1450_v63  ;;  %v1829_v32 = vadd.f32 %v1828_v1, %v1827_v61  ;;  %v1893_v8 = vadd.f32 %v1892_v2, %v1891_v62 }
 0x34f   : > { %v1830_v3 = vpop.f32.mrf.mxu0  ;;  %v1894_v4 = vpop.f32.mrf.mxu1 }
 0x350   : > { %1579 = vst [vmem:[%s2709_s13 + $0x50] sm:$0xff] %v1547_v25  ;;  %v1453_v7 = vadd.f32 %v1829_v32, %v2704_v55 }
 0x351   : > { %v1831_v60 = vpop.f32.mrf.mxu0  ;;  %v1895_v9 = vpop.f32.mrf.mxu1 }
 0x352   : > { %v1550_v16 = vadd.f32 %v1893_v8, %v1453_v7  ;;  %v1832_v17 = vadd.f32 %v1831_v60, %v1830_v3  ;;  %v1896_v10 = vadd.f32 %v1895_v9, %v1894_v4 }
 0x353   : > { %v1833_v18 = vpop.f32.mrf.mxu0  ;;  %v1897_v59 = vpop.f32.mrf.mxu1 }
 0x354   : > { %1580 = vst [vmem:[%s2709_s13 + $0x58] sm:$0xff] %v1550_v16  ;;  %v1458_v19 = vadd.f32 %v1832_v17, %v2704_v55 }
 0x355   : > { %v1834_v20 = vpop.f32.mrf.mxu0  ;;  %v1898_v40 = vpop.f32.mrf.mxu1 }
 0x356   : > { %v1555_v21 = vadd.f32 %v1896_v10, %v1458_v19  ;;  %v1835_v23 = vadd.f32 %v1834_v20, %v1833_v18  ;;  %v1899_v28 = vadd.f32 %v1898_v40, %v1897_v59 }
 0x357   : > { %v1836_v26 = vpop.f32.mrf.mxu0  ;;  %v1900_v27 = vpop.f32.mrf.mxu1 }
 0x358   : > { %1581 = vst [vmem:[%s2709_s13 + $0x60] sm:$0xff] %v1555_v21  ;;  %v1461_v6 = vadd.f32 %v1835_v23, %v2704_v55 }
 0x359   : > { %v1837_v29 = vpop.f32.mrf.mxu0  ;;  %v1901_v5 = vpop.f32.mrf.mxu1 }
 0x35a   : > { %v1558_v30 = vadd.f32 %v1899_v28, %v1461_v6  ;;  %v1838_v39 = vadd.f32 %v1837_v29, %v1836_v26  ;;  %v1902_v37 = vadd.f32 %v1901_v5, %v1900_v27 }
 0x35b   : > { %v1839_v12 = vpop.f32.mrf.mxu0  ;;  %v1903_v34 = vpop.f32.mrf.mxu1 }
 0x35c   : > { %1582 = vst [vmem:[%s2709_s13 + $0x68] sm:$0xff] %v1558_v30  ;;  %v1466_v35 = vadd.f32 %v1838_v39, %v2704_v55 }
 0x35d   : > { %v1840_v22 = vpop.f32.mrf.mxu0  ;;  %v1904_v38 = vpop.f32.mrf.mxu1 }
 0x35e   : > { %v1563_v47 = vadd.f32 %v1902_v37, %v1466_v35  ;;  %v1841_v11 = vadd.f32 %v1840_v22, %v1839_v12  ;;  %v1905_v41 = vadd.f32 %v1904_v38, %v1903_v34 }
 0x360   : > { %1583 = vst [vmem:[%s2709_s13 + $0x70] sm:$0xff] %v1563_v47  ;;  %v1469_v57 = vadd.f32 %v1841_v11, %v2704_v55 }
 0x362   : > { %v1566_v54 = vadd.f32 %v1905_v41, %v1469_v57 }
 0x364   : > { %1584 = vst [vmem:[%s2709_s13 + $0x78] sm:$0xff] %v1566_v54 }
 0x365   : > { %2187 = shalt.err (!%p2184_p9)
}
 0x366   : > { %s2188_s23 = scalar_lea.hbm %s2746_s19, 2048  ;;  %s2192_s21 = scalar_lea.hbm %s2799_s7, 4096 }
 0x367   : > { %p2189_p13 = scmp.ne.s32.totalorder %s2746_s19, %s2188_s23  ;;  %p2193_p4 = scmp.lt.s32.totalorder %s2746_s19, %s2799_s7 }
 0x368   : > { %p2194_p8 = scmp.lt.s32.totalorder %s2192_s21, %s2188_s23 }
 0x369   : > { %p2190_p5 = pnand %p2189_p13, %p2817_p10 }
 0x36a   : > { %p2195_p7 = por %p2194_p8, %p2193_p4 }
 0x36b   : > { %p2191_p0 = pneg %p2190_p5 }
 0x36d   : > { %p2196_p11 = pnand %p2195_p7, %p2191_p0 }
 0x36f   : > { %2199 = shalt.err (!%p2196_p11)
}
 0x370   : > { %s2255_s3 = smov 128   ;;  %s2256_s18 = smov 8  }
 0x371   : > { %1916 = dma.vmem_to_hbm [thread:$0]  (%p2817_p10), %s2748_s14, 2048, %s2746_s19, %s1586_s30, %s2255_s3, %s2255_s3, %s2256_s18  }
 0x372 PF: > { %s1614_s9 = sand.u32 1, %s2230_s24   ;;  %p2818_p1 = scmp.ne.s32.totalorder %s2806_s8, 0 }
 0x373   : > { %p2819_p2 = scmp.ge.s32.totalorder %s2242_s27, 2  ;;  %s1615_s28 = scalar_lea.sflag [#allocation4], %s1614_s9 }
 0x375   : > { %p1930_p6 = pnand %p2819_p2, %p2818_p1 }
 0x377   : > { %p1931_p12 = pneg %p1930_p6 }
 0x379   : > { %2225 = dma.done.wait (%p1931_p12), %s1615_s28, 2048  }
 0x37a   : > { %2227 = vsyncadd (%p1931_p12), %s1615_s28, 4294965248  ;;  %p21_p3 = scmp.ge.s32.totalorder %s2369_s10, 4   ;;  %s2820_s24 = smov %s2234_s25 }
 0x37b   : > { %s2821_s25 = smov %s2238_s26  ;;  %s2822_s26 = smov %s2378_s15 }
 0x37c   : > { %s2823_s27 = smov %s2369_s10  ;;  %23 = sbr.rel (!%p21_p3) target bundleno = 8 (0x8), region = 101 }
 0x381   :  { %1620 = vsyncpa [#allocation3], 1 }
 0x382   :  { %1622 = vsyncpa [#allocation3 + $0x1], 1 }
 0x383   :  { %1623 = vsyncpa [#allocation6], 1 }
 0x384   :  { %1624 = vsyncpa [#allocation4], 1 }
 0x385   :  { %1626 = vsyncpa [#allocation4 + $0x1], 1 }

</bundles_post_ra>
